<compile_context>
chip_gen: v6e
topology: v6e:2x2x1
jax: 0.10.0
libtpu: 0.0.40
codegen_flags: <defaults>
</compile_context>

<pallas_src>
import jax
import jax.numpy as jnp
from jax.experimental import pallas as pl
from jax.experimental.pallas import tpu as pltpu


def _transpose_kernel(x_ref, o_ref):
    # x_ref: (H, Sb, D)   slab of the (B, H, S, D) input
    # o_ref: (Sb, H * D)  lane-dense slab of the (B, S, H*D) output
    H, _, D = x_ref.shape
    if H % 2 == 0:
        # Merge half-lane-wide (D = 64) heads pairwise into a 2*D = 128-lane
        # tile and store it directly to its 128-aligned output slice.
        # No full (Sb, H*D) value is ever materialized -> no vreg spill.
        for i in range(H // 2):
            pair = jnp.concatenate(
                [x_ref[2 * i], x_ref[2 * i + 1]], axis=-1)       # (Sb, 2*D)
            o_ref[:, pl.ds(2 * i * D, 2 * D)] = pair             # unmasked vst
    else:
        # Fallback for odd H: per-head stores (correct, but masked / slower).
        for h in range(H):
            o_ref[:, pl.ds(h * D, D)] = x_ref[h]


def transpose_21(x: jax.Array, *, s_block: int = 192) -> jax.Array:
    """Equivalent of torch's x.transpose(2, 1) on a 4-D tensor (B, H, S, D)."""
    B, H, S, D = x.shape
    if S % s_block != 0:
        # Fallback: single tile along S (block == full dim keeps the (8,128)
        # rule satisfied for ragged / small sequence lengths).
        s_block = S
    grid = (B, S // s_block)

    out_flat = pl.pallas_call(
        _transpose_kernel,
        out_shape=jax.ShapeDtypeStruct((B, S, H * D), x.dtype),
        grid_spec=pltpu.PrefetchScalarGridSpec(
            num_scalar_prefetch=0,
            grid=grid,
            in_specs=[
                # B squeezed out; kernel sees (H, Sb, D).
                pl.BlockSpec((None, H, s_block, D), lambda b, s: (b, 0, s, 0)),
            ],
            # B squeezed out; kernel sees (Sb, H*D) -- lane-dense last dim,
            # so the write-back DMA is one contiguous slab.
            out_specs=pl.BlockSpec((None, s_block, H * D),
                                   lambda b, s: (b, s, 0)),
        ),
        compiler_params=pltpu.CompilerParams(
            dimension_semantics=("parallel", "parallel"),
        ),
        cost_estimate=pl.CostEstimate(
            flops=0,
            transcendentals=0,
            bytes_accessed=2 * B * H * S * D * x.dtype.itemsize,
        ),
    )(x)

    # (B, S, H*D) -> (B, S, H, D): bit-identical layout, metadata-only reshape.
    return out_flat.reshape(B, S, H, D)


if __name__ == "__main__":
    key = jax.random.PRNGKey(0)
    # Shape implied by the module: torch.Size([1, 12, 384, 64])
    x425 = jax.random.normal(key, (1, 12, 384, 64), dtype=jnp.float32)

    x426 = transpose_21(x425)
    jax.block_until_ready(x426)

    # Correctness check vs plain-JAX reference (pure data movement -> exact).
    ref = jnp.transpose(x425, (0, 2, 1, 3))
    assert x426.shape == (1, 384, 12, 64), x426.shape
    assert jnp.array_equal(x426, ref), "mismatch vs reference transpose"

    print("KERNEL_OK")
</pallas_src>

<mosaic_0001>
module attributes {stable_mosaic.version = 11 : i64} {
  func.func @_transpose_kernel(%arg0: i32, %arg1: i32, %arg2: memref<1x12x192x64xf32, #tpu.memory_space<vmem>>, %arg3: memref<1x192x768xf32, #tpu.memory_space<vmem>>) attributes {dimension_semantics = [#tpu.dimension_semantics<parallel>, #tpu.dimension_semantics<parallel>], iteration_bounds = array<i64: 1, 2>, scalar_prefetch = 0 : i64, scratch_operands = 0 : i64, tpu.core_type = #tpu.core_type<tc>, window_params = [{transform_indices = @transform_0, window_bounds = array<i64: 1, 12, 192, 64>}, {transform_indices = @transform_1, window_bounds = array<i64: 1, 192, 768>}]} {
    %c0 = arith.constant 0 : index
    %c0_0 = arith.constant 0 : index
    %c0_1 = arith.constant 0 : index
    %c0_2 = arith.constant 0 : index
    %0 = vector.load %arg2[%c0, %c0_0, %c0_1, %c0_2] : memref<1x12x192x64xf32, #tpu.memory_space<vmem>>, vector<1x1x192x64xf32>
    %1 = vector.shape_cast %0 : vector<1x1x192x64xf32> to vector<192x64xf32>
    %c0_3 = arith.constant 0 : index
    %c1 = arith.constant 1 : index
    %c0_4 = arith.constant 0 : index
    %c0_5 = arith.constant 0 : index
    %2 = vector.load %arg2[%c0_3, %c1, %c0_4, %c0_5] : memref<1x12x192x64xf32, #tpu.memory_space<vmem>>, vector<1x1x192x64xf32>
    %3 = vector.shape_cast %2 : vector<1x1x192x64xf32> to vector<192x64xf32>
    %4 = tpu.concatenate %1, %3 in 1 : vector<192x64xf32>, vector<192x64xf32> -> vector<192x128xf32>
    %c0_6 = arith.constant 0 : index
    %c0_7 = arith.constant 0 : index
    %c0_8 = arith.constant 0 : index
    %5 = vector.load %arg3[%c0_6, %c0_7, %c0_8] : memref<1x192x768xf32, #tpu.memory_space<vmem>>, vector<1x192x128xf32>
    %6 = vector.shape_cast %5 : vector<1x192x128xf32> to vector<192x128xf32>
    %7 = vector.shape_cast %4 : vector<192x128xf32> to vector<1x192x128xf32>
    tpu.vector_store %arg3[%c0_6, %c0_7, %c0_8], %7 {strides = array<i32>} : memref<1x192x768xf32, #tpu.memory_space<vmem>>, vector<1x192x128xf32>,
    %c0_9 = arith.constant 0 : index
    %c2 = arith.constant 2 : index
    %c0_10 = arith.constant 0 : index
    %c0_11 = arith.constant 0 : index
    %8 = vector.load %arg2[%c0_9, %c2, %c0_10, %c0_11] : memref<1x12x192x64xf32, #tpu.memory_space<vmem>>, vector<1x1x192x64xf32>
    %9 = vector.shape_cast %8 : vector<1x1x192x64xf32> to vector<192x64xf32>
    %c0_12 = arith.constant 0 : index
    %c3 = arith.constant 3 : index
    %c0_13 = arith.constant 0 : index
    %c0_14 = arith.constant 0 : index
    %10 = vector.load %arg2[%c0_12, %c3, %c0_13, %c0_14] : memref<1x12x192x64xf32, #tpu.memory_space<vmem>>, vector<1x1x192x64xf32>
    %11 = vector.shape_cast %10 : vector<1x1x192x64xf32> to vector<192x64xf32>
    %12 = tpu.concatenate %9, %11 in 1 : vector<192x64xf32>, vector<192x64xf32> -> vector<192x128xf32>
    %c0_15 = arith.constant 0 : index
    %c0_16 = arith.constant 0 : index
    %c128 = arith.constant 128 : index
    %13 = vector.load %arg3[%c0_15, %c0_16, %c128] : memref<1x192x768xf32, #tpu.memory_space<vmem>>, vector<1x192x128xf32>
    %14 = vector.shape_cast %13 : vector<1x192x128xf32> to vector<192x128xf32>
    %15 = vector.shape_cast %12 : vector<192x128xf32> to vector<1x192x128xf32>
    tpu.vector_store %arg3[%c0_15, %c0_16, %c128], %15 {strides = array<i32>} : memref<1x192x768xf32, #tpu.memory_space<vmem>>, vector<1x192x128xf32>,
    %c0_17 = arith.constant 0 : index
    %c4 = arith.constant 4 : index
    %c0_18 = arith.constant 0 : index
    %c0_19 = arith.constant 0 : index
    %16 = vector.load %arg2[%c0_17, %c4, %c0_18, %c0_19] : memref<1x12x192x64xf32, #tpu.memory_space<vmem>>, vector<1x1x192x64xf32>
    %17 = vector.shape_cast %16 : vector<1x1x192x64xf32> to vector<192x64xf32>
    %c0_20 = arith.constant 0 : index
    %c5 = arith.constant 5 : index
    %c0_21 = arith.constant 0 : index
    %c0_22 = arith.constant 0 : index
    %18 = vector.load %arg2[%c0_20, %c5, %c0_21, %c0_22] : memref<1x12x192x64xf32, #tpu.memory_space<vmem>>, vector<1x1x192x64xf32>
    %19 = vector.shape_cast %18 : vector<1x1x192x64xf32> to vector<192x64xf32>
    %20 = tpu.concatenate %17, %19 in 1 : vector<192x64xf32>, vector<192x64xf32> -> vector<192x128xf32>
    %c0_23 = arith.constant 0 : index
    %c0_24 = arith.constant 0 : index
    %c256 = arith.constant 256 : index
    %21 = vector.load %arg3[%c0_23, %c0_24, %c256] : memref<1x192x768xf32, #tpu.memory_space<vmem>>, vector<1x192x128xf32>
    %22 = vector.shape_cast %21 : vector<1x192x128xf32> to vector<192x128xf32>
    %23 = vector.shape_cast %20 : vector<192x128xf32> to vector<1x192x128xf32>
    tpu.vector_store %arg3[%c0_23, %c0_24, %c256], %23 {strides = array<i32>} : memref<1x192x768xf32, #tpu.memory_space<vmem>>, vector<1x192x128xf32>,
    %c0_25 = arith.constant 0 : index
    %c6 = arith.constant 6 : index
    %c0_26 = arith.constant 0 : index
    %c0_27 = arith.constant 0 : index
    %24 = vector.load %arg2[%c0_25, %c6, %c0_26, %c0_27] : memref<1x12x192x64xf32, #tpu.memory_space<vmem>>, vector<1x1x192x64xf32>
    %25 = vector.shape_cast %24 : vector<1x1x192x64xf32> to vector<192x64xf32>
    %c0_28 = arith.constant 0 : index
    %c7 = arith.constant 7 : index
    %c0_29 = arith.constant 0 : index
    %c0_30 = arith.constant 0 : index
    %26 = vector.load %arg2[%c0_28, %c7, %c0_29, %c0_30] : memref<1x12x192x64xf32, #tpu.memory_space<vmem>>, vector<1x1x192x64xf32>
    %27 = vector.shape_cast %26 : vector<1x1x192x64xf32> to vector<192x64xf32>
    %28 = tpu.concatenate %25, %27 in 1 : vector<192x64xf32>, vector<192x64xf32> -> vector<192x128xf32>
    %c0_31 = arith.constant 0 : index
    %c0_32 = arith.constant 0 : index
    %c384 = arith.constant 384 : index
    %29 = vector.load %arg3[%c0_31, %c0_32, %c384] : memref<1x192x768xf32, #tpu.memory_space<vmem>>, vector<1x192x128xf32>
    %30 = vector.shape_cast %29 : vector<1x192x128xf32> to vector<192x128xf32>
    %31 = vector.shape_cast %28 : vector<192x128xf32> to vector<1x192x128xf32>
    tpu.vector_store %arg3[%c0_31, %c0_32, %c384], %31 {strides = array<i32>} : memref<1x192x768xf32, #tpu.memory_space<vmem>>, vector<1x192x128xf32>,
    %c0_33 = arith.constant 0 : index
    %c8 = arith.constant 8 : index
    %c0_34 = arith.constant 0 : index
    %c0_35 = arith.constant 0 : index
    %32 = vector.load %arg2[%c0_33, %c8, %c0_34, %c0_35] : memref<1x12x192x64xf32, #tpu.memory_space<vmem>>, vector<1x1x192x64xf32>
    %33 = vector.shape_cast %32 : vector<1x1x192x64xf32> to vector<192x64xf32>
    %c0_36 = arith.constant 0 : index
    %c9 = arith.constant 9 : index
    %c0_37 = arith.constant 0 : index
    %c0_38 = arith.constant 0 : index
    %34 = vector.load %arg2[%c0_36, %c9, %c0_37, %c0_38] : memref<1x12x192x64xf32, #tpu.memory_space<vmem>>, vector<1x1x192x64xf32>
    %35 = vector.shape_cast %34 : vector<1x1x192x64xf32> to vector<192x64xf32>
    %36 = tpu.concatenate %33, %35 in 1 : vector<192x64xf32>, vector<192x64xf32> -> vector<192x128xf32>
    %c0_39 = arith.constant 0 : index
    %c0_40 = arith.constant 0 : index
    %c512 = arith.constant 512 : index
    %37 = vector.load %arg3[%c0_39, %c0_40, %c512] : memref<1x192x768xf32, #tpu.memory_space<vmem>>, vector<1x192x128xf32>
    %38 = vector.shape_cast %37 : vector<1x192x128xf32> to vector<192x128xf32>
    %39 = vector.shape_cast %36 : vector<192x128xf32> to vector<1x192x128xf32>
    tpu.vector_store %arg3[%c0_39, %c0_40, %c512], %39 {strides = array<i32>} : memref<1x192x768xf32, #tpu.memory_space<vmem>>, vector<1x192x128xf32>,
    %c0_41 = arith.constant 0 : index
    %c10 = arith.constant 10 : index
    %c0_42 = arith.constant 0 : index
    %c0_43 = arith.constant 0 : index
    %40 = vector.load %arg2[%c0_41, %c10, %c0_42, %c0_43] : memref<1x12x192x64xf32, #tpu.memory_space<vmem>>, vector<1x1x192x64xf32>
    %41 = vector.shape_cast %40 : vector<1x1x192x64xf32> to vector<192x64xf32>
    %c0_44 = arith.constant 0 : index
    %c11 = arith.constant 11 : index
    %c0_45 = arith.constant 0 : index
    %c0_46 = arith.constant 0 : index
    %42 = vector.load %arg2[%c0_44, %c11, %c0_45, %c0_46] : memref<1x12x192x64xf32, #tpu.memory_space<vmem>>, vector<1x1x192x64xf32>
    %43 = vector.shape_cast %42 : vector<1x1x192x64xf32> to vector<192x64xf32>
    %44 = tpu.concatenate %41, %43 in 1 : vector<192x64xf32>, vector<192x64xf32> -> vector<192x128xf32>
    %c0_47 = arith.constant 0 : index
    %c0_48 = arith.constant 0 : index
    %c640 = arith.constant 640 : index
    %45 = vector.load %arg3[%c0_47, %c0_48, %c640] : memref<1x192x768xf32, #tpu.memory_space<vmem>>, vector<1x192x128xf32>
    %46 = vector.shape_cast %45 : vector<1x192x128xf32> to vector<192x128xf32>
    %47 = vector.shape_cast %44 : vector<192x128xf32> to vector<1x192x128xf32>
    tpu.vector_store %arg3[%c0_47, %c0_48, %c640], %47 {strides = array<i32>} : memref<1x192x768xf32, #tpu.memory_space<vmem>>, vector<1x192x128xf32>,
    return
  }
  func.func @transform_0(%arg0: i32, %arg1: i32) -> (i32, i32, i32, i32) {
    %c0_i32 = arith.constant 0 : i32
    %c0_i32_0 = arith.constant 0 : i32
    %c0_i32_1 = arith.constant 0 : i32
    return %arg0, %c0_i32, %arg1, %c0_i32_0 : i32, i32, i32, i32
  }
  func.func @transform_1(%arg0: i32, %arg1: i32) -> (i32, i32, i32) {
    %c0_i32 = arith.constant 0 : i32
    %c0_i32_0 = arith.constant 0 : i32
    return %arg0, %arg1, %c0_i32 : i32, i32, i32
  }
}

</mosaic_0001>

<bundles_post_ra>
// kernel: tpu_custom_call.1
= control target key start
LH: loop header
LB: loop body
LE: loop exit
PB: predicated region body
PF: predicated region fallthrough
CT: control target
= control target key end

     0   :  { %6 = vsyncpa [#allocation4], 0  ;;  %s4439_s0 = inlined_call_operand.vmem [shape: f32[1,12,384,64], index: 0, kind: input, shape index: {}]   ;;  %s4440_s1 = inlined_call_operand.hbm [shape: f32[1,384,768], index: 1, kind: output, shape index: {}]  }
   0x1   :  { %8 = vsyncpa [#allocation4 + $0x1], 0  ;;  %s3011_s6 = smov 0   ;;  %s3013_s7 = smov 0  }
   0x2   :  { %s3015_s8 = smov 0   ;;  %s3017_s9 = smov 0  }
   0x3   :  { %s3019_s10 = smov 0   ;;  %s3021_s11 = smov 0  }
   0x4 LB: > { %s2582_s12 = sadd.s32 4294967295, %s2995_s11   ;;  %s2583_s13 = sadd.s32 4294967294, %s2995_s11   ;;  %s2995_s11 = sphi %s3021_s11, %s14_s11   ;;  %s2991_s10 = sphi %s3019_s10, %s4447_s10   ;;  %s2987_s9 = sphi %s3017_s9, %s4446_s9   ;;  %s2983_s8 = sphi %s3015_s8, %s4445_s8   ;;  %s2979_s7 = sphi %s3013_s7, %s4444_s7   ;;  %s2975_s6 = sphi %s3011_s6, %s4443_s6  }
   0x5   : > { %s23_s14 = sadd.s32 1, %s2991_s10  ;;  %s35_s15 = sadd.s32 1, %s2983_s8 }
   0x6   : > { %p24_p0 = scmp.ge.s32.totalorder %s23_s14, 2  ;;  %p42_p1 = scmp.ne.s32.totalorder %s2983_s8, %s2979_s7 }
   0x7   : > { %p43_p2 = scmp.eq.s32.totalorder %s2995_s11, 0  ;;  %p74_p3 = scmp.eq.s32.totalorder %s2582_s12, 1 }
   0x8   : > { %s4449_s14 = smov (%p24_p0, %s23_s14), 0  ;;  %p79_p6 = scmp.ne.s32.totalorder %s2979_s7, %s2975_s6 }
   0x9   : > { %p44_p4 = por %p43_p2, %p42_p1  ;;  %p3050_p5 = por %p74_p3, %p42_p1 }
   0xa   : > { %s31_s17 = ssub.s32 %s2991_s10, %s4449_s14  ;;  %p80_p8 = scmp.eq.s32.totalorder %s2583_s13, 1 }
   0xb   : > { %p33_p7 = scmp.eq.s32.totalorder %s31_s17, 0  ;;  %p2585_p10 = scmp.ge.s32.totalorder %s2995_s11, 2 }
   0xc   : > { %p3061_p9 = por %p80_p8, %p79_p6 }
   0xd   : > { %s3059_s18 = scalar_select %p33_p7, %s2983_s8, %s35_s15  }
   0xe   : > { %96 = sbr.rel (%p2585_p10) target bundleno = 168 (0xa8), region = 16 }
  0x13   : > { %99 = sbr.rel (!%p44_p4) target bundleno = 168 (0xa8), region = 20  ;;  %s101_s20 = sand.u32 (%p44_p4), 1, %s2983_s8  }
  0x14   : > { %s2855_s21 = smul.u32 (%p44_p4), 192, %s2991_s10 }
  0x15   : > { %s2856_s22 = smul.u32 (%p44_p4), 2304, %s101_s20 }
  0x16   : > { %s3073_s25 = scalar_lea.vmem (%p44_p4), %s4439_s0, %s2855_s21 }
  0x17   : > { %v711_v0 = vld [vmem:[%s3073_s25] sm:$0xff] (%p44_p4)  ;;  %v713_v1 = vld [vmem:[%s3073_s25 + $0x8] sm:$0xff] (%p44_p4)  ;;  %v715_v2 = vld [vmem:[%s3073_s25 + $0x10] sm:$0xff] (%p44_p4)  ;;  %s3078_s26 = scalar_lea.vmem (%p44_p4), [#allocation2], %s2856_s22 }
  0x18   : > { %712 = vst [vmem:[%s3078_s26] sm:$0xff] %v711_v0  ;;  %714 = vst [vmem:[%s3078_s26 + $0x8] sm:$0xff] %v713_v1  ;;  %v717_v3 = vld [vmem:[%s3073_s25 + $0x18] sm:$0xff]  ;;  %v719_v4 = vld [vmem:[%s3073_s25 + $0x20] sm:$0xff] }
  0x19   : > { %716 = vst [vmem:[%s3078_s26 + $0x10] sm:$0xff] %v715_v2  ;;  %v721_v5 = vld [vmem:[%s3073_s25 + $0x28] sm:$0xff]  ;;  %718 = vst [vmem:[%s3078_s26 + $0x18] sm:$0xff] %v717_v3  ;;  %v723_v6 = vld [vmem:[%s3073_s25 + $0x30] sm:$0xff] }
  0x1a   : > { %720 = vst [vmem:[%s3078_s26 + $0x20] sm:$0xff] %v719_v4  ;;  %722 = vst [vmem:[%s3078_s26 + $0x28] sm:$0xff] %v721_v5  ;;  %v725_v7 = vld [vmem:[%s3073_s25 + $0x38] sm:$0xff]  ;;  %v727_v8 = vld [vmem:[%s3073_s25 + $0x40] sm:$0xff] }
  0x1b   : > { %724 = vst [vmem:[%s3078_s26 + $0x30] sm:$0xff] %v723_v6  ;;  %726 = vst [vmem:[%s3078_s26 + $0x38] sm:$0xff] %v725_v7  ;;  %v729_v9 = vld [vmem:[%s3073_s25 + $0x48] sm:$0xff]  ;;  %v731_v10 = vld [vmem:[%s3073_s25 + $0x50] sm:$0xff] }
  0x1c   : > { %728 = vst [vmem:[%s3078_s26 + $0x40] sm:$0xff] %v727_v8  ;;  %v733_v11 = vld [vmem:[%s3073_s25 + $0x58] sm:$0xff]  ;;  %730 = vst [vmem:[%s3078_s26 + $0x48] sm:$0xff] %v729_v9  ;;  %v735_v12 = vld [vmem:[%s3073_s25 + $0x60] sm:$0xff] }
  0x1d   : > { %732 = vst [vmem:[%s3078_s26 + $0x50] sm:$0xff] %v731_v10  ;;  %734 = vst [vmem:[%s3078_s26 + $0x58] sm:$0xff] %v733_v11  ;;  %v737_v13 = vld [vmem:[%s3073_s25 + $0x68] sm:$0xff]  ;;  %v739_v14 = vld [vmem:[%s3073_s25 + $0x70] sm:$0xff] }
  0x1e   : > { %736 = vst [vmem:[%s3078_s26 + $0x60] sm:$0xff] %v735_v12  ;;  %738 = vst [vmem:[%s3078_s26 + $0x68] sm:$0xff] %v737_v13  ;;  %v741_v15 = vld [vmem:[%s3073_s25 + $0x78] sm:$0xff]  ;;  %v743_v16 = vld [vmem:[%s3073_s25 + $0x80] sm:$0xff] }
  0x1f   : > { %740 = vst [vmem:[%s3078_s26 + $0x70] sm:$0xff] %v739_v14  ;;  %v745_v17 = vld [vmem:[%s3073_s25 + $0x88] sm:$0xff]  ;;  %742 = vst [vmem:[%s3078_s26 + $0x78] sm:$0xff] %v741_v15  ;;  %v747_v18 = vld [vmem:[%s3073_s25 + $0x90] sm:$0xff] }
  0x20   : > { %744 = vst [vmem:[%s3078_s26 + $0x80] sm:$0xff] %v743_v16  ;;  %746 = vst [vmem:[%s3078_s26 + $0x88] sm:$0xff] %v745_v17  ;;  %v749_v19 = vld [vmem:[%s3073_s25 + $0x98] sm:$0xff]  ;;  %v751_v20 = vld [vmem:[%s3073_s25 + $0xa0] sm:$0xff] }
  0x21   : > { %748 = vst [vmem:[%s3078_s26 + $0x90] sm:$0xff] %v747_v18  ;;  %750 = vst [vmem:[%s3078_s26 + $0x98] sm:$0xff] %v749_v19  ;;  %v753_v21 = vld [vmem:[%s3073_s25 + $0xa8] sm:$0xff]  ;;  %v755_v22 = vld [vmem:[%s3073_s25 + $0xb0] sm:$0xff] }
  0x22   : > { %752 = vst [vmem:[%s3078_s26 + $0xa0] sm:$0xff] %v751_v20  ;;  %v757_v23 = vld [vmem:[%s3073_s25 + $0xb8] sm:$0xff]  ;;  %754 = vst [vmem:[%s3078_s26 + $0xa8] sm:$0xff] %v753_v21  ;;  %v759_v24 = vld [vmem:[%s3073_s25 + $0x180] sm:$0xff] }
  0x23   : > { %756 = vst [vmem:[%s3078_s26 + $0xb0] sm:$0xff] %v755_v22  ;;  %758 = vst [vmem:[%s3078_s26 + $0xb8] sm:$0xff] %v757_v23  ;;  %v761_v25 = vld [vmem:[%s3073_s25 + $0x188] sm:$0xff]  ;;  %v763_v26 = vld [vmem:[%s3073_s25 + $0x190] sm:$0xff] }
  0x24   : > { %760 = vst [vmem:[%s3078_s26 + $0xc0] sm:$0xff] %v759_v24  ;;  %762 = vst [vmem:[%s3078_s26 + $0xc8] sm:$0xff] %v761_v25  ;;  %v765_v27 = vld [vmem:[%s3073_s25 + $0x198] sm:$0xff]  ;;  %v767_v28 = vld [vmem:[%s3073_s25 + $0x1a0] sm:$0xff] }
  0x25   : > { %764 = vst [vmem:[%s3078_s26 + $0xd0] sm:$0xff] %v763_v26  ;;  %v769_v29 = vld [vmem:[%s3073_s25 + $0x1a8] sm:$0xff]  ;;  %766 = vst [vmem:[%s3078_s26 + $0xd8] sm:$0xff] %v765_v27  ;;  %v771_v30 = vld [vmem:[%s3073_s25 + $0x1b0] sm:$0xff] }
  0x26   : > { %768 = vst [vmem:[%s3078_s26 + $0xe0] sm:$0xff] %v767_v28  ;;  %770 = vst [vmem:[%s3078_s26 + $0xe8] sm:$0xff] %v769_v29  ;;  %v773_v31 = vld [vmem:[%s3073_s25 + $0x1b8] sm:$0xff]  ;;  %v775_v32 = vld [vmem:[%s3073_s25 + $0x1c0] sm:$0xff] }
  0x27   : > { %772 = vst [vmem:[%s3078_s26 + $0xf0] sm:$0xff] %v771_v30  ;;  %774 = vst [vmem:[%s3078_s26 + $0xf8] sm:$0xff] %v773_v31  ;;  %v777_v33 = vld [vmem:[%s3073_s25 + $0x1c8] sm:$0xff]  ;;  %v779_v34 = vld [vmem:[%s3073_s25 + $0x1d0] sm:$0xff] }
  0x28   : > { %776 = vst [vmem:[%s3078_s26 + $0x100] sm:$0xff] %v775_v32  ;;  %v781_v35 = vld [vmem:[%s3073_s25 + $0x1d8] sm:$0xff]  ;;  %778 = vst [vmem:[%s3078_s26 + $0x108] sm:$0xff] %v777_v33  ;;  %v783_v36 = vld [vmem:[%s3073_s25 + $0x1e0] sm:$0xff] }
  0x29   : > { %780 = vst [vmem:[%s3078_s26 + $0x110] sm:$0xff] %v779_v34  ;;  %782 = vst [vmem:[%s3078_s26 + $0x118] sm:$0xff] %v781_v35  ;;  %v785_v37 = vld [vmem:[%s3073_s25 + $0x1e8] sm:$0xff]  ;;  %v787_v38 = vld [vmem:[%s3073_s25 + $0x1f0] sm:$0xff] }
  0x2a   : > { %784 = vst [vmem:[%s3078_s26 + $0x120] sm:$0xff] %v783_v36  ;;  %786 = vst [vmem:[%s3078_s26 + $0x128] sm:$0xff] %v785_v37  ;;  %v789_v39 = vld [vmem:[%s3073_s25 + $0x1f8] sm:$0xff]  ;;  %v791_v40 = vld [vmem:[%s3073_s25 + $0x200] sm:$0xff] }
  0x2b   : > { %788 = vst [vmem:[%s3078_s26 + $0x130] sm:$0xff] %v787_v38  ;;  %v793_v41 = vld [vmem:[%s3073_s25 + $0x208] sm:$0xff]  ;;  %790 = vst [vmem:[%s3078_s26 + $0x138] sm:$0xff] %v789_v39  ;;  %v795_v42 = vld [vmem:[%s3073_s25 + $0x210] sm:$0xff] }
  0x2c   : > { %792 = vst [vmem:[%s3078_s26 + $0x140] sm:$0xff] %v791_v40  ;;  %794 = vst [vmem:[%s3078_s26 + $0x148] sm:$0xff] %v793_v41  ;;  %v797_v43 = vld [vmem:[%s3073_s25 + $0x218] sm:$0xff]  ;;  %v799_v44 = vld [vmem:[%s3073_s25 + $0x220] sm:$0xff] }
  0x2d   : > { %796 = vst [vmem:[%s3078_s26 + $0x150] sm:$0xff] %v795_v42  ;;  %798 = vst [vmem:[%s3078_s26 + $0x158] sm:$0xff] %v797_v43  ;;  %v801_v45 = vld [vmem:[%s3073_s25 + $0x228] sm:$0xff]  ;;  %v803_v46 = vld [vmem:[%s3073_s25 + $0x230] sm:$0xff] }
  0x2e   : > { %800 = vst [vmem:[%s3078_s26 + $0x160] sm:$0xff] %v799_v44  ;;  %v805_v47 = vld [vmem:[%s3073_s25 + $0x238] sm:$0xff]  ;;  %802 = vst [vmem:[%s3078_s26 + $0x168] sm:$0xff] %v801_v45  ;;  %v807_v48 = vld [vmem:[%s3073_s25 + $0x300] sm:$0xff] }
  0x2f   : > { %804 = vst [vmem:[%s3078_s26 + $0x170] sm:$0xff] %v803_v46  ;;  %806 = vst [vmem:[%s3078_s26 + $0x178] sm:$0xff] %v805_v47  ;;  %v809_v49 = vld [vmem:[%s3073_s25 + $0x308] sm:$0xff]  ;;  %v811_v50 = vld [vmem:[%s3073_s25 + $0x310] sm:$0xff] }
  0x30   : > { %808 = vst [vmem:[%s3078_s26 + $0x180] sm:$0xff] %v807_v48  ;;  %810 = vst [vmem:[%s3078_s26 + $0x188] sm:$0xff] %v809_v49  ;;  %v813_v51 = vld [vmem:[%s3073_s25 + $0x318] sm:$0xff]  ;;  %v815_v52 = vld [vmem:[%s3073_s25 + $0x320] sm:$0xff] }
  0x31   : > { %812 = vst [vmem:[%s3078_s26 + $0x190] sm:$0xff] %v811_v50  ;;  %v817_v53 = vld [vmem:[%s3073_s25 + $0x328] sm:$0xff]  ;;  %814 = vst [vmem:[%s3078_s26 + $0x198] sm:$0xff] %v813_v51  ;;  %v819_v54 = vld [vmem:[%s3073_s25 + $0x330] sm:$0xff] }
  0x32   : > { %816 = vst [vmem:[%s3078_s26 + $0x1a0] sm:$0xff] %v815_v52  ;;  %818 = vst [vmem:[%s3078_s26 + $0x1a8] sm:$0xff] %v817_v53  ;;  %v821_v55 = vld [vmem:[%s3073_s25 + $0x338] sm:$0xff]  ;;  %v823_v56 = vld [vmem:[%s3073_s25 + $0x340] sm:$0xff] }
  0x33   : > { %820 = vst [vmem:[%s3078_s26 + $0x1b0] sm:$0xff] %v819_v54  ;;  %822 = vst [vmem:[%s3078_s26 + $0x1b8] sm:$0xff] %v821_v55  ;;  %v825_v57 = vld [vmem:[%s3073_s25 + $0x348] sm:$0xff]  ;;  %v827_v58 = vld [vmem:[%s3073_s25 + $0x350] sm:$0xff] }
  0x34   : > { %824 = vst [vmem:[%s3078_s26 + $0x1c0] sm:$0xff] %v823_v56  ;;  %v829_v59 = vld [vmem:[%s3073_s25 + $0x358] sm:$0xff]  ;;  %826 = vst [vmem:[%s3078_s26 + $0x1c8] sm:$0xff] %v825_v57  ;;  %v831_v60 = vld [vmem:[%s3073_s25 + $0x360] sm:$0xff] }
  0x35   : > { %828 = vst [vmem:[%s3078_s26 + $0x1d0] sm:$0xff] %v827_v58  ;;  %830 = vst [vmem:[%s3078_s26 + $0x1d8] sm:$0xff] %v829_v59  ;;  %v833_v61 = vld [vmem:[%s3073_s25 + $0x368] sm:$0xff]  ;;  %v835_v62 = vld [vmem:[%s3073_s25 + $0x370] sm:$0xff] }
  0x36   : > { %832 = vst [vmem:[%s3078_s26 + $0x1e0] sm:$0xff] %v831_v60  ;;  %834 = vst [vmem:[%s3078_s26 + $0x1e8] sm:$0xff] %v833_v61  ;;  %v837_v63 = vld [vmem:[%s3073_s25 + $0x378] sm:$0xff]  ;;  %v839_v0 = vld [vmem:[%s3073_s25 + $0x380] sm:$0xff] }
  0x37   : > { %836 = vst [vmem:[%s3078_s26 + $0x1f0] sm:$0xff] %v835_v62  ;;  %v841_v1 = vld [vmem:[%s3073_s25 + $0x388] sm:$0xff]  ;;  %838 = vst [vmem:[%s3078_s26 + $0x1f8] sm:$0xff] %v837_v63  ;;  %v843_v2 = vld [vmem:[%s3073_s25 + $0x390] sm:$0xff] }
  0x38   : > { %840 = vst [vmem:[%s3078_s26 + $0x200] sm:$0xff] %v839_v0  ;;  %842 = vst [vmem:[%s3078_s26 + $0x208] sm:$0xff] %v841_v1  ;;  %v845_v3 = vld [vmem:[%s3073_s25 + $0x398] sm:$0xff]  ;;  %v847_v4 = vld [vmem:[%s3073_s25 + $0x3a0] sm:$0xff] }
  0x39   : > { %844 = vst [vmem:[%s3078_s26 + $0x210] sm:$0xff] %v843_v2  ;;  %846 = vst [vmem:[%s3078_s26 + $0x218] sm:$0xff] %v845_v3  ;;  %v849_v5 = vld [vmem:[%s3073_s25 + $0x3a8] sm:$0xff]  ;;  %v851_v6 = vld [vmem:[%s3073_s25 + $0x3b0] sm:$0xff] }
  0x3a   : > { %848 = vst [vmem:[%s3078_s26 + $0x220] sm:$0xff] %v847_v4  ;;  %v853_v7 = vld [vmem:[%s3073_s25 + $0x3b8] sm:$0xff]  ;;  %850 = vst [vmem:[%s3078_s26 + $0x228] sm:$0xff] %v849_v5  ;;  %v855_v8 = vld [vmem:[%s3073_s25 + $0x480] sm:$0xff] }
  0x3b   : > { %852 = vst [vmem:[%s3078_s26 + $0x230] sm:$0xff] %v851_v6  ;;  %854 = vst [vmem:[%s3078_s26 + $0x238] sm:$0xff] %v853_v7  ;;  %v857_v9 = vld [vmem:[%s3073_s25 + $0x488] sm:$0xff]  ;;  %v859_v10 = vld [vmem:[%s3073_s25 + $0x490] sm:$0xff] }
  0x3c   : > { %856 = vst [vmem:[%s3078_s26 + $0x240] sm:$0xff] %v855_v8  ;;  %858 = vst [vmem:[%s3078_s26 + $0x248] sm:$0xff] %v857_v9  ;;  %v861_v11 = vld [vmem:[%s3073_s25 + $0x498] sm:$0xff]  ;;  %v863_v12 = vld [vmem:[%s3073_s25 + $0x4a0] sm:$0xff] }
  0x3d   : > { %860 = vst [vmem:[%s3078_s26 + $0x250] sm:$0xff] %v859_v10  ;;  %v865_v13 = vld [vmem:[%s3073_s25 + $0x4a8] sm:$0xff]  ;;  %862 = vst [vmem:[%s3078_s26 + $0x258] sm:$0xff] %v861_v11  ;;  %v867_v14 = vld [vmem:[%s3073_s25 + $0x4b0] sm:$0xff] }
  0x3e   : > { %864 = vst [vmem:[%s3078_s26 + $0x260] sm:$0xff] %v863_v12  ;;  %866 = vst [vmem:[%s3078_s26 + $0x268] sm:$0xff] %v865_v13  ;;  %v869_v15 = vld [vmem:[%s3073_s25 + $0x4b8] sm:$0xff]  ;;  %v871_v16 = vld [vmem:[%s3073_s25 + $0x4c0] sm:$0xff] }
  0x3f   : > { %868 = vst [vmem:[%s3078_s26 + $0x270] sm:$0xff] %v867_v14  ;;  %870 = vst [vmem:[%s3078_s26 + $0x278] sm:$0xff] %v869_v15  ;;  %v873_v17 = vld [vmem:[%s3073_s25 + $0x4c8] sm:$0xff]  ;;  %v875_v18 = vld [vmem:[%s3073_s25 + $0x4d0] sm:$0xff] }
  0x40   : > { %872 = vst [vmem:[%s3078_s26 + $0x280] sm:$0xff] %v871_v16  ;;  %v877_v19 = vld [vmem:[%s3073_s25 + $0x4d8] sm:$0xff]  ;;  %874 = vst [vmem:[%s3078_s26 + $0x288] sm:$0xff] %v873_v17  ;;  %v879_v20 = vld [vmem:[%s3073_s25 + $0x4e0] sm:$0xff] }
  0x41   : > { %876 = vst [vmem:[%s3078_s26 + $0x290] sm:$0xff] %v875_v18  ;;  %878 = vst [vmem:[%s3078_s26 + $0x298] sm:$0xff] %v877_v19  ;;  %v881_v21 = vld [vmem:[%s3073_s25 + $0x4e8] sm:$0xff]  ;;  %v883_v22 = vld [vmem:[%s3073_s25 + $0x4f0] sm:$0xff] }
  0x42   : > { %880 = vst [vmem:[%s3078_s26 + $0x2a0] sm:$0xff] %v879_v20  ;;  %882 = vst [vmem:[%s3078_s26 + $0x2a8] sm:$0xff] %v881_v21  ;;  %v885_v23 = vld [vmem:[%s3073_s25 + $0x4f8] sm:$0xff]  ;;  %v887_v24 = vld [vmem:[%s3073_s25 + $0x500] sm:$0xff] }
  0x43   : > { %884 = vst [vmem:[%s3078_s26 + $0x2b0] sm:$0xff] %v883_v22  ;;  %v889_v25 = vld [vmem:[%s3073_s25 + $0x508] sm:$0xff]  ;;  %886 = vst [vmem:[%s3078_s26 + $0x2b8] sm:$0xff] %v885_v23  ;;  %v891_v26 = vld [vmem:[%s3073_s25 + $0x510] sm:$0xff] }
  0x44   : > { %888 = vst [vmem:[%s3078_s26 + $0x2c0] sm:$0xff] %v887_v24  ;;  %890 = vst [vmem:[%s3078_s26 + $0x2c8] sm:$0xff] %v889_v25  ;;  %v893_v27 = vld [vmem:[%s3073_s25 + $0x518] sm:$0xff]  ;;  %v895_v28 = vld [vmem:[%s3073_s25 + $0x520] sm:$0xff] }
  0x45   : > { %892 = vst [vmem:[%s3078_s26 + $0x2d0] sm:$0xff] %v891_v26  ;;  %894 = vst [vmem:[%s3078_s26 + $0x2d8] sm:$0xff] %v893_v27  ;;  %v897_v29 = vld [vmem:[%s3073_s25 + $0x528] sm:$0xff]  ;;  %v899_v30 = vld [vmem:[%s3073_s25 + $0x530] sm:$0xff] }
  0x46   : > { %896 = vst [vmem:[%s3078_s26 + $0x2e0] sm:$0xff] %v895_v28  ;;  %v901_v31 = vld [vmem:[%s3073_s25 + $0x538] sm:$0xff]  ;;  %898 = vst [vmem:[%s3078_s26 + $0x2e8] sm:$0xff] %v897_v29  ;;  %v903_v32 = vld [vmem:[%s3073_s25 + $0x600] sm:$0xff] }
  0x47   : > { %900 = vst [vmem:[%s3078_s26 + $0x2f0] sm:$0xff] %v899_v30  ;;  %902 = vst [vmem:[%s3078_s26 + $0x2f8] sm:$0xff] %v901_v31  ;;  %v905_v33 = vld [vmem:[%s3073_s25 + $0x608] sm:$0xff]  ;;  %v907_v34 = vld [vmem:[%s3073_s25 + $0x610] sm:$0xff] }
  0x48   : > { %904 = vst [vmem:[%s3078_s26 + $0x300] sm:$0xff] %v903_v32  ;;  %906 = vst [vmem:[%s3078_s26 + $0x308] sm:$0xff] %v905_v33  ;;  %v909_v35 = vld [vmem:[%s3073_s25 + $0x618] sm:$0xff]  ;;  %v911_v36 = vld [vmem:[%s3073_s25 + $0x620] sm:$0xff] }
  0x49   : > { %908 = vst [vmem:[%s3078_s26 + $0x310] sm:$0xff] %v907_v34  ;;  %v913_v37 = vld [vmem:[%s3073_s25 + $0x628] sm:$0xff]  ;;  %910 = vst [vmem:[%s3078_s26 + $0x318] sm:$0xff] %v909_v35  ;;  %v915_v38 = vld [vmem:[%s3073_s25 + $0x630] sm:$0xff] }
  0x4a   : > { %912 = vst [vmem:[%s3078_s26 + $0x320] sm:$0xff] %v911_v36  ;;  %914 = vst [vmem:[%s3078_s26 + $0x328] sm:$0xff] %v913_v37  ;;  %v917_v39 = vld [vmem:[%s3073_s25 + $0x638] sm:$0xff]  ;;  %v919_v40 = vld [vmem:[%s3073_s25 + $0x640] sm:$0xff] }
  0x4b   : > { %916 = vst [vmem:[%s3078_s26 + $0x330] sm:$0xff] %v915_v38  ;;  %918 = vst [vmem:[%s3078_s26 + $0x338] sm:$0xff] %v917_v39  ;;  %v921_v41 = vld [vmem:[%s3073_s25 + $0x648] sm:$0xff]  ;;  %v923_v42 = vld [vmem:[%s3073_s25 + $0x650] sm:$0xff] }
  0x4c   : > { %920 = vst [vmem:[%s3078_s26 + $0x340] sm:$0xff] %v919_v40  ;;  %v925_v43 = vld [vmem:[%s3073_s25 + $0x658] sm:$0xff]  ;;  %922 = vst [vmem:[%s3078_s26 + $0x348] sm:$0xff] %v921_v41  ;;  %v927_v44 = vld [vmem:[%s3073_s25 + $0x660] sm:$0xff] }
  0x4d   : > { %924 = vst [vmem:[%s3078_s26 + $0x350] sm:$0xff] %v923_v42  ;;  %926 = vst [vmem:[%s3078_s26 + $0x358] sm:$0xff] %v925_v43  ;;  %v929_v45 = vld [vmem:[%s3073_s25 + $0x668] sm:$0xff]  ;;  %v931_v46 = vld [vmem:[%s3073_s25 + $0x670] sm:$0xff] }
  0x4e   : > { %928 = vst [vmem:[%s3078_s26 + $0x360] sm:$0xff] %v927_v44  ;;  %930 = vst [vmem:[%s3078_s26 + $0x368] sm:$0xff] %v929_v45  ;;  %v933_v47 = vld [vmem:[%s3073_s25 + $0x678] sm:$0xff]  ;;  %v935_v48 = vld [vmem:[%s3073_s25 + $0x680] sm:$0xff] }
  0x4f   : > { %932 = vst [vmem:[%s3078_s26 + $0x370] sm:$0xff] %v931_v46  ;;  %v937_v49 = vld [vmem:[%s3073_s25 + $0x688] sm:$0xff]  ;;  %934 = vst [vmem:[%s3078_s26 + $0x378] sm:$0xff] %v933_v47  ;;  %v939_v50 = vld [vmem:[%s3073_s25 + $0x690] sm:$0xff] }
  0x50   : > { %936 = vst [vmem:[%s3078_s26 + $0x380] sm:$0xff] %v935_v48  ;;  %938 = vst [vmem:[%s3078_s26 + $0x388] sm:$0xff] %v937_v49  ;;  %v941_v51 = vld [vmem:[%s3073_s25 + $0x698] sm:$0xff]  ;;  %v943_v52 = vld [vmem:[%s3073_s25 + $0x6a0] sm:$0xff] }
  0x51   : > { %940 = vst [vmem:[%s3078_s26 + $0x390] sm:$0xff] %v939_v50  ;;  %942 = vst [vmem:[%s3078_s26 + $0x398] sm:$0xff] %v941_v51  ;;  %v945_v53 = vld [vmem:[%s3073_s25 + $0x6a8] sm:$0xff]  ;;  %v947_v54 = vld [vmem:[%s3073_s25 + $0x6b0] sm:$0xff] }
  0x52   : > { %944 = vst [vmem:[%s3078_s26 + $0x3a0] sm:$0xff] %v943_v52  ;;  %v949_v55 = vld [vmem:[%s3073_s25 + $0x6b8] sm:$0xff]  ;;  %946 = vst [vmem:[%s3078_s26 + $0x3a8] sm:$0xff] %v945_v53  ;;  %v951_v56 = vld [vmem:[%s3073_s25 + $0x780] sm:$0xff] }
  0x53   : > { %948 = vst [vmem:[%s3078_s26 + $0x3b0] sm:$0xff] %v947_v54  ;;  %950 = vst [vmem:[%s3078_s26 + $0x3b8] sm:$0xff] %v949_v55  ;;  %v953_v57 = vld [vmem:[%s3073_s25 + $0x788] sm:$0xff]  ;;  %v955_v58 = vld [vmem:[%s3073_s25 + $0x790] sm:$0xff] }
  0x54   : > { %952 = vst [vmem:[%s3078_s26 + $0x3c0] sm:$0xff] %v951_v56  ;;  %954 = vst [vmem:[%s3078_s26 + $0x3c8] sm:$0xff] %v953_v57  ;;  %v957_v59 = vld [vmem:[%s3073_s25 + $0x798] sm:$0xff]  ;;  %v959_v60 = vld [vmem:[%s3073_s25 + $0x7a0] sm:$0xff] }
  0x55   : > { %956 = vst [vmem:[%s3078_s26 + $0x3d0] sm:$0xff] %v955_v58  ;;  %v961_v61 = vld [vmem:[%s3073_s25 + $0x7a8] sm:$0xff]  ;;  %958 = vst [vmem:[%s3078_s26 + $0x3d8] sm:$0xff] %v957_v59  ;;  %v963_v62 = vld [vmem:[%s3073_s25 + $0x7b0] sm:$0xff] }
  0x56   : > { %960 = vst [vmem:[%s3078_s26 + $0x3e0] sm:$0xff] %v959_v60  ;;  %962 = vst [vmem:[%s3078_s26 + $0x3e8] sm:$0xff] %v961_v61  ;;  %v965_v63 = vld [vmem:[%s3073_s25 + $0x7b8] sm:$0xff]  ;;  %v967_v0 = vld [vmem:[%s3073_s25 + $0x7c0] sm:$0xff] }
  0x57   : > { %964 = vst [vmem:[%s3078_s26 + $0x3f0] sm:$0xff] %v963_v62  ;;  %966 = vst [vmem:[%s3078_s26 + $0x3f8] sm:$0xff] %v965_v63  ;;  %v969_v1 = vld [vmem:[%s3073_s25 + $0x7c8] sm:$0xff]  ;;  %v971_v2 = vld [vmem:[%s3073_s25 + $0x7d0] sm:$0xff] }
  0x58   : > { %968 = vst [vmem:[%s3078_s26 + $0x400] sm:$0xff] %v967_v0  ;;  %v973_v3 = vld [vmem:[%s3073_s25 + $0x7d8] sm:$0xff]  ;;  %970 = vst [vmem:[%s3078_s26 + $0x408] sm:$0xff] %v969_v1  ;;  %v975_v4 = vld [vmem:[%s3073_s25 + $0x7e0] sm:$0xff] }
  0x59   : > { %972 = vst [vmem:[%s3078_s26 + $0x410] sm:$0xff] %v971_v2  ;;  %974 = vst [vmem:[%s3078_s26 + $0x418] sm:$0xff] %v973_v3  ;;  %v977_v5 = vld [vmem:[%s3073_s25 + $0x7e8] sm:$0xff]  ;;  %v979_v6 = vld [vmem:[%s3073_s25 + $0x7f0] sm:$0xff] }
  0x5a   : > { %976 = vst [vmem:[%s3078_s26 + $0x420] sm:$0xff] %v975_v4  ;;  %978 = vst [vmem:[%s3078_s26 + $0x428] sm:$0xff] %v977_v5  ;;  %v981_v7 = vld [vmem:[%s3073_s25 + $0x7f8] sm:$0xff]  ;;  %v983_v8 = vld [vmem:[%s3073_s25 + $0x800] sm:$0xff] }
  0x5b   : > { %980 = vst [vmem:[%s3078_s26 + $0x430] sm:$0xff] %v979_v6  ;;  %v985_v9 = vld [vmem:[%s3073_s25 + $0x808] sm:$0xff]  ;;  %982 = vst [vmem:[%s3078_s26 + $0x438] sm:$0xff] %v981_v7  ;;  %v987_v10 = vld [vmem:[%s3073_s25 + $0x810] sm:$0xff] }
  0x5c   : > { %984 = vst [vmem:[%s3078_s26 + $0x440] sm:$0xff] %v983_v8  ;;  %986 = vst [vmem:[%s3078_s26 + $0x448] sm:$0xff] %v985_v9  ;;  %v989_v11 = vld [vmem:[%s3073_s25 + $0x818] sm:$0xff]  ;;  %v991_v12 = vld [vmem:[%s3073_s25 + $0x820] sm:$0xff] }
  0x5d   : > { %988 = vst [vmem:[%s3078_s26 + $0x450] sm:$0xff] %v987_v10  ;;  %990 = vst [vmem:[%s3078_s26 + $0x458] sm:$0xff] %v989_v11  ;;  %v993_v13 = vld [vmem:[%s3073_s25 + $0x828] sm:$0xff]  ;;  %v995_v14 = vld [vmem:[%s3073_s25 + $0x830] sm:$0xff] }
  0x5e   : > { %992 = vst [vmem:[%s3078_s26 + $0x460] sm:$0xff] %v991_v12  ;;  %v997_v15 = vld [vmem:[%s3073_s25 + $0x838] sm:$0xff]  ;;  %994 = vst [vmem:[%s3078_s26 + $0x468] sm:$0xff] %v993_v13  ;;  %v999_v16 = vld [vmem:[%s3073_s25 + $0x900] sm:$0xff] }
  0x5f   : > { %996 = vst [vmem:[%s3078_s26 + $0x470] sm:$0xff] %v995_v14  ;;  %998 = vst [vmem:[%s3078_s26 + $0x478] sm:$0xff] %v997_v15  ;;  %v1001_v17 = vld [vmem:[%s3073_s25 + $0x908] sm:$0xff]  ;;  %v1003_v18 = vld [vmem:[%s3073_s25 + $0x910] sm:$0xff] }
  0x60   : > { %1000 = vst [vmem:[%s3078_s26 + $0x480] sm:$0xff] %v999_v16  ;;  %1002 = vst [vmem:[%s3078_s26 + $0x488] sm:$0xff] %v1001_v17  ;;  %v1005_v19 = vld [vmem:[%s3073_s25 + $0x918] sm:$0xff]  ;;  %v1007_v20 = vld [vmem:[%s3073_s25 + $0x920] sm:$0xff] }
  0x61   : > { %1004 = vst [vmem:[%s3078_s26 + $0x490] sm:$0xff] %v1003_v18  ;;  %v1009_v21 = vld [vmem:[%s3073_s25 + $0x928] sm:$0xff]  ;;  %1006 = vst [vmem:[%s3078_s26 + $0x498] sm:$0xff] %v1005_v19  ;;  %v1011_v22 = vld [vmem:[%s3073_s25 + $0x930] sm:$0xff] }
  0x62   : > { %1008 = vst [vmem:[%s3078_s26 + $0x4a0] sm:$0xff] %v1007_v20  ;;  %1010 = vst [vmem:[%s3078_s26 + $0x4a8] sm:$0xff] %v1009_v21  ;;  %v1013_v23 = vld [vmem:[%s3073_s25 + $0x938] sm:$0xff]  ;;  %v1015_v24 = vld [vmem:[%s3073_s25 + $0x940] sm:$0xff] }
  0x63   : > { %1012 = vst [vmem:[%s3078_s26 + $0x4b0] sm:$0xff] %v1011_v22  ;;  %1014 = vst [vmem:[%s3078_s26 + $0x4b8] sm:$0xff] %v1013_v23  ;;  %v1017_v25 = vld [vmem:[%s3073_s25 + $0x948] sm:$0xff]  ;;  %v1019_v26 = vld [vmem:[%s3073_s25 + $0x950] sm:$0xff] }
  0x64   : > { %1016 = vst [vmem:[%s3078_s26 + $0x4c0] sm:$0xff] %v1015_v24  ;;  %v1021_v27 = vld [vmem:[%s3073_s25 + $0x958] sm:$0xff]  ;;  %1018 = vst [vmem:[%s3078_s26 + $0x4c8] sm:$0xff] %v1017_v25  ;;  %v1023_v28 = vld [vmem:[%s3073_s25 + $0x960] sm:$0xff] }
  0x65   : > { %1020 = vst [vmem:[%s3078_s26 + $0x4d0] sm:$0xff] %v1019_v26  ;;  %1022 = vst [vmem:[%s3078_s26 + $0x4d8] sm:$0xff] %v1021_v27  ;;  %v1025_v29 = vld [vmem:[%s3073_s25 + $0x968] sm:$0xff]  ;;  %v1027_v30 = vld [vmem:[%s3073_s25 + $0x970] sm:$0xff] }
  0x66   : > { %1024 = vst [vmem:[%s3078_s26 + $0x4e0] sm:$0xff] %v1023_v28  ;;  %1026 = vst [vmem:[%s3078_s26 + $0x4e8] sm:$0xff] %v1025_v29  ;;  %v1029_v31 = vld [vmem:[%s3073_s25 + $0x978] sm:$0xff]  ;;  %v1031_v32 = vld [vmem:[%s3073_s25 + $0x980] sm:$0xff] }
  0x67   : > { %1028 = vst [vmem:[%s3078_s26 + $0x4f0] sm:$0xff] %v1027_v30  ;;  %v1033_v33 = vld [vmem:[%s3073_s25 + $0x988] sm:$0xff]  ;;  %1030 = vst [vmem:[%s3078_s26 + $0x4f8] sm:$0xff] %v1029_v31  ;;  %v1035_v34 = vld [vmem:[%s3073_s25 + $0x990] sm:$0xff] }
  0x68   : > { %1032 = vst [vmem:[%s3078_s26 + $0x500] sm:$0xff] %v1031_v32  ;;  %1034 = vst [vmem:[%s3078_s26 + $0x508] sm:$0xff] %v1033_v33  ;;  %v1037_v35 = vld [vmem:[%s3073_s25 + $0x998] sm:$0xff]  ;;  %v1039_v36 = vld [vmem:[%s3073_s25 + $0x9a0] sm:$0xff] }
  0x69   : > { %1036 = vst [vmem:[%s3078_s26 + $0x510] sm:$0xff] %v1035_v34  ;;  %1038 = vst [vmem:[%s3078_s26 + $0x518] sm:$0xff] %v1037_v35  ;;  %v1041_v37 = vld [vmem:[%s3073_s25 + $0x9a8] sm:$0xff]  ;;  %v1043_v38 = vld [vmem:[%s3073_s25 + $0x9b0] sm:$0xff] }
  0x6a   : > { %1040 = vst [vmem:[%s3078_s26 + $0x520] sm:$0xff] %v1039_v36  ;;  %v1045_v39 = vld [vmem:[%s3073_s25 + $0x9b8] sm:$0xff]  ;;  %1042 = vst [vmem:[%s3078_s26 + $0x528] sm:$0xff] %v1041_v37  ;;  %v1047_v40 = vld [vmem:[%s3073_s25 + $0xa80] sm:$0xff] }
  0x6b   : > { %1044 = vst [vmem:[%s3078_s26 + $0x530] sm:$0xff] %v1043_v38  ;;  %1046 = vst [vmem:[%s3078_s26 + $0x538] sm:$0xff] %v1045_v39  ;;  %v1049_v41 = vld [vmem:[%s3073_s25 + $0xa88] sm:$0xff]  ;;  %v1051_v42 = vld [vmem:[%s3073_s25 + $0xa90] sm:$0xff] }
  0x6c   : > { %1048 = vst [vmem:[%s3078_s26 + $0x540] sm:$0xff] %v1047_v40  ;;  %1050 = vst [vmem:[%s3078_s26 + $0x548] sm:$0xff] %v1049_v41  ;;  %v1053_v43 = vld [vmem:[%s3073_s25 + $0xa98] sm:$0xff]  ;;  %v1055_v44 = vld [vmem:[%s3073_s25 + $0xaa0] sm:$0xff] }
  0x6d   : > { %1052 = vst [vmem:[%s3078_s26 + $0x550] sm:$0xff] %v1051_v42  ;;  %v1057_v45 = vld [vmem:[%s3073_s25 + $0xaa8] sm:$0xff]  ;;  %1054 = vst [vmem:[%s3078_s26 + $0x558] sm:$0xff] %v1053_v43  ;;  %v1059_v46 = vld [vmem:[%s3073_s25 + $0xab0] sm:$0xff] }
  0x6e   : > { %1056 = vst [vmem:[%s3078_s26 + $0x560] sm:$0xff] %v1055_v44  ;;  %1058 = vst [vmem:[%s3078_s26 + $0x568] sm:$0xff] %v1057_v45  ;;  %v1061_v47 = vld [vmem:[%s3073_s25 + $0xab8] sm:$0xff]  ;;  %v1063_v48 = vld [vmem:[%s3073_s25 + $0xac0] sm:$0xff] }
  0x6f   : > { %1060 = vst [vmem:[%s3078_s26 + $0x570] sm:$0xff] %v1059_v46  ;;  %1062 = vst [vmem:[%s3078_s26 + $0x578] sm:$0xff] %v1061_v47  ;;  %v1065_v49 = vld [vmem:[%s3073_s25 + $0xac8] sm:$0xff]  ;;  %v1067_v50 = vld [vmem:[%s3073_s25 + $0xad0] sm:$0xff] }
  0x70   : > { %1064 = vst [vmem:[%s3078_s26 + $0x580] sm:$0xff] %v1063_v48  ;;  %v1069_v51 = vld [vmem:[%s3073_s25 + $0xad8] sm:$0xff]  ;;  %1066 = vst [vmem:[%s3078_s26 + $0x588] sm:$0xff] %v1065_v49  ;;  %v1071_v52 = vld [vmem:[%s3073_s25 + $0xae0] sm:$0xff] }
  0x71   : > { %1068 = vst [vmem:[%s3078_s26 + $0x590] sm:$0xff] %v1067_v50  ;;  %1070 = vst [vmem:[%s3078_s26 + $0x598] sm:$0xff] %v1069_v51  ;;  %v1073_v53 = vld [vmem:[%s3073_s25 + $0xae8] sm:$0xff]  ;;  %v1075_v54 = vld [vmem:[%s3073_s25 + $0xaf0] sm:$0xff] }
  0x72   : > { %1072 = vst [vmem:[%s3078_s26 + $0x5a0] sm:$0xff] %v1071_v52  ;;  %1074 = vst [vmem:[%s3078_s26 + $0x5a8] sm:$0xff] %v1073_v53  ;;  %v1077_v55 = vld [vmem:[%s3073_s25 + $0xaf8] sm:$0xff]  ;;  %v1079_v56 = vld [vmem:[%s3073_s25 + $0xb00] sm:$0xff] }
  0x73   : > { %1076 = vst [vmem:[%s3078_s26 + $0x5b0] sm:$0xff] %v1075_v54  ;;  %v1081_v57 = vld [vmem:[%s3073_s25 + $0xb08] sm:$0xff]  ;;  %1078 = vst [vmem:[%s3078_s26 + $0x5b8] sm:$0xff] %v1077_v55  ;;  %v1083_v58 = vld [vmem:[%s3073_s25 + $0xb10] sm:$0xff] }
  0x74   : > { %1080 = vst [vmem:[%s3078_s26 + $0x5c0] sm:$0xff] %v1079_v56  ;;  %1082 = vst [vmem:[%s3078_s26 + $0x5c8] sm:$0xff] %v1081_v57  ;;  %v1085_v59 = vld [vmem:[%s3073_s25 + $0xb18] sm:$0xff]  ;;  %v1087_v60 = vld [vmem:[%s3073_s25 + $0xb20] sm:$0xff] }
  0x75   : > { %1084 = vst [vmem:[%s3078_s26 + $0x5d0] sm:$0xff] %v1083_v58  ;;  %1086 = vst [vmem:[%s3078_s26 + $0x5d8] sm:$0xff] %v1085_v59  ;;  %v1089_v61 = vld [vmem:[%s3073_s25 + $0xb28] sm:$0xff]  ;;  %v1091_v62 = vld [vmem:[%s3073_s25 + $0xb30] sm:$0xff] }
  0x76   : > { %1088 = vst [vmem:[%s3078_s26 + $0x5e0] sm:$0xff] %v1087_v60  ;;  %v1093_v63 = vld [vmem:[%s3073_s25 + $0xb38] sm:$0xff]  ;;  %1090 = vst [vmem:[%s3078_s26 + $0x5e8] sm:$0xff] %v1089_v61  ;;  %v1095_v0 = vld [vmem:[%s3073_s25 + $0xc00] sm:$0xff] }
  0x77   : > { %1092 = vst [vmem:[%s3078_s26 + $0x5f0] sm:$0xff] %v1091_v62  ;;  %1094 = vst [vmem:[%s3078_s26 + $0x5f8] sm:$0xff] %v1093_v63  ;;  %v1097_v1 = vld [vmem:[%s3073_s25 + $0xc08] sm:$0xff]  ;;  %v1099_v2 = vld [vmem:[%s3073_s25 + $0xc10] sm:$0xff] }
  0x78   : > { %1096 = vst [vmem:[%s3078_s26 + $0x600] sm:$0xff] %v1095_v0  ;;  %1098 = vst [vmem:[%s3078_s26 + $0x608] sm:$0xff] %v1097_v1  ;;  %v1101_v3 = vld [vmem:[%s3073_s25 + $0xc18] sm:$0xff]  ;;  %v1103_v4 = vld [vmem:[%s3073_s25 + $0xc20] sm:$0xff] }
  0x79   : > { %1100 = vst [vmem:[%s3078_s26 + $0x610] sm:$0xff] %v1099_v2  ;;  %v1105_v5 = vld [vmem:[%s3073_s25 + $0xc28] sm:$0xff]  ;;  %1102 = vst [vmem:[%s3078_s26 + $0x618] sm:$0xff] %v1101_v3  ;;  %v1107_v6 = vld [vmem:[%s3073_s25 + $0xc30] sm:$0xff] }
  0x7a   : > { %1104 = vst [vmem:[%s3078_s26 + $0x620] sm:$0xff] %v1103_v4  ;;  %1106 = vst [vmem:[%s3078_s26 + $0x628] sm:$0xff] %v1105_v5  ;;  %v1109_v7 = vld [vmem:[%s3073_s25 + $0xc38] sm:$0xff]  ;;  %v1111_v8 = vld [vmem:[%s3073_s25 + $0xc40] sm:$0xff] }
  0x7b   : > { %1108 = vst [vmem:[%s3078_s26 + $0x630] sm:$0xff] %v1107_v6  ;;  %1110 = vst [vmem:[%s3078_s26 + $0x638] sm:$0xff] %v1109_v7  ;;  %v1113_v9 = vld [vmem:[%s3073_s25 + $0xc48] sm:$0xff]  ;;  %v1115_v10 = vld [vmem:[%s3073_s25 + $0xc50] sm:$0xff] }
  0x7c   : > { %1112 = vst [vmem:[%s3078_s26 + $0x640] sm:$0xff] %v1111_v8  ;;  %v1117_v11 = vld [vmem:[%s3073_s25 + $0xc58] sm:$0xff]  ;;  %1114 = vst [vmem:[%s3078_s26 + $0x648] sm:$0xff] %v1113_v9  ;;  %v1119_v12 = vld [vmem:[%s3073_s25 + $0xc60] sm:$0xff] }
  0x7d   : > { %1116 = vst [vmem:[%s3078_s26 + $0x650] sm:$0xff] %v1115_v10  ;;  %1118 = vst [vmem:[%s3078_s26 + $0x658] sm:$0xff] %v1117_v11  ;;  %v1121_v13 = vld [vmem:[%s3073_s25 + $0xc68] sm:$0xff]  ;;  %v1123_v14 = vld [vmem:[%s3073_s25 + $0xc70] sm:$0xff] }
  0x7e   : > { %1120 = vst [vmem:[%s3078_s26 + $0x660] sm:$0xff] %v1119_v12  ;;  %1122 = vst [vmem:[%s3078_s26 + $0x668] sm:$0xff] %v1121_v13  ;;  %v1125_v15 = vld [vmem:[%s3073_s25 + $0xc78] sm:$0xff]  ;;  %v1127_v16 = vld [vmem:[%s3073_s25 + $0xc80] sm:$0xff] }
  0x7f   : > { %1124 = vst [vmem:[%s3078_s26 + $0x670] sm:$0xff] %v1123_v14  ;;  %v1129_v17 = vld [vmem:[%s3073_s25 + $0xc88] sm:$0xff]  ;;  %1126 = vst [vmem:[%s3078_s26 + $0x678] sm:$0xff] %v1125_v15  ;;  %v1131_v18 = vld [vmem:[%s3073_s25 + $0xc90] sm:$0xff] }
  0x80   : > { %1128 = vst [vmem:[%s3078_s26 + $0x680] sm:$0xff] %v1127_v16  ;;  %1130 = vst [vmem:[%s3078_s26 + $0x688] sm:$0xff] %v1129_v17  ;;  %v1133_v19 = vld [vmem:[%s3073_s25 + $0xc98] sm:$0xff]  ;;  %v1135_v20 = vld [vmem:[%s3073_s25 + $0xca0] sm:$0xff] }
  0x81   : > { %1132 = vst [vmem:[%s3078_s26 + $0x690] sm:$0xff] %v1131_v18  ;;  %1134 = vst [vmem:[%s3078_s26 + $0x698] sm:$0xff] %v1133_v19  ;;  %v1137_v21 = vld [vmem:[%s3073_s25 + $0xca8] sm:$0xff]  ;;  %v1139_v22 = vld [vmem:[%s3073_s25 + $0xcb0] sm:$0xff] }
  0x82   : > { %1136 = vst [vmem:[%s3078_s26 + $0x6a0] sm:$0xff] %v1135_v20  ;;  %v1141_v23 = vld [vmem:[%s3073_s25 + $0xcb8] sm:$0xff]  ;;  %1138 = vst [vmem:[%s3078_s26 + $0x6a8] sm:$0xff] %v1137_v21  ;;  %v1143_v24 = vld [vmem:[%s3073_s25 + $0xd80] sm:$0xff] }
  0x83   : > { %1140 = vst [vmem:[%s3078_s26 + $0x6b0] sm:$0xff] %v1139_v22  ;;  %1142 = vst [vmem:[%s3078_s26 + $0x6b8] sm:$0xff] %v1141_v23  ;;  %v1145_v25 = vld [vmem:[%s3073_s25 + $0xd88] sm:$0xff]  ;;  %v1147_v26 = vld [vmem:[%s3073_s25 + $0xd90] sm:$0xff] }
  0x84   : > { %1144 = vst [vmem:[%s3078_s26 + $0x6c0] sm:$0xff] %v1143_v24  ;;  %1146 = vst [vmem:[%s3078_s26 + $0x6c8] sm:$0xff] %v1145_v25  ;;  %v1149_v27 = vld [vmem:[%s3073_s25 + $0xd98] sm:$0xff]  ;;  %v1151_v28 = vld [vmem:[%s3073_s25 + $0xda0] sm:$0xff] }
  0x85   : > { %1148 = vst [vmem:[%s3078_s26 + $0x6d0] sm:$0xff] %v1147_v26  ;;  %v1153_v29 = vld [vmem:[%s3073_s25 + $0xda8] sm:$0xff]  ;;  %1150 = vst [vmem:[%s3078_s26 + $0x6d8] sm:$0xff] %v1149_v27  ;;  %v1155_v30 = vld [vmem:[%s3073_s25 + $0xdb0] sm:$0xff] }
  0x86   : > { %1152 = vst [vmem:[%s3078_s26 + $0x6e0] sm:$0xff] %v1151_v28  ;;  %1154 = vst [vmem:[%s3078_s26 + $0x6e8] sm:$0xff] %v1153_v29  ;;  %v1157_v31 = vld [vmem:[%s3073_s25 + $0xdb8] sm:$0xff]  ;;  %v1159_v32 = vld [vmem:[%s3073_s25 + $0xdc0] sm:$0xff] }
  0x87   : > { %1156 = vst [vmem:[%s3078_s26 + $0x6f0] sm:$0xff] %v1155_v30  ;;  %1158 = vst [vmem:[%s3078_s26 + $0x6f8] sm:$0xff] %v1157_v31  ;;  %v1161_v33 = vld [vmem:[%s3073_s25 + $0xdc8] sm:$0xff]  ;;  %v1163_v34 = vld [vmem:[%s3073_s25 + $0xdd0] sm:$0xff] }
  0x88   : > { %1160 = vst [vmem:[%s3078_s26 + $0x700] sm:$0xff] %v1159_v32  ;;  %v1165_v35 = vld [vmem:[%s3073_s25 + $0xdd8] sm:$0xff]  ;;  %1162 = vst [vmem:[%s3078_s26 + $0x708] sm:$0xff] %v1161_v33  ;;  %v1167_v36 = vld [vmem:[%s3073_s25 + $0xde0] sm:$0xff] }
  0x89   : > { %1164 = vst [vmem:[%s3078_s26 + $0x710] sm:$0xff] %v1163_v34  ;;  %1166 = vst [vmem:[%s3078_s26 + $0x718] sm:$0xff] %v1165_v35  ;;  %v1169_v37 = vld [vmem:[%s3073_s25 + $0xde8] sm:$0xff]  ;;  %v1171_v38 = vld [vmem:[%s3073_s25 + $0xdf0] sm:$0xff] }
  0x8a   : > { %1168 = vst [vmem:[%s3078_s26 + $0x720] sm:$0xff] %v1167_v36  ;;  %1170 = vst [vmem:[%s3078_s26 + $0x728] sm:$0xff] %v1169_v37  ;;  %v1173_v39 = vld [vmem:[%s3073_s25 + $0xdf8] sm:$0xff]  ;;  %v1175_v40 = vld [vmem:[%s3073_s25 + $0xe00] sm:$0xff] }
  0x8b   : > { %1172 = vst [vmem:[%s3078_s26 + $0x730] sm:$0xff] %v1171_v38  ;;  %v1177_v41 = vld [vmem:[%s3073_s25 + $0xe08] sm:$0xff]  ;;  %1174 = vst [vmem:[%s3078_s26 + $0x738] sm:$0xff] %v1173_v39  ;;  %v1179_v42 = vld [vmem:[%s3073_s25 + $0xe10] sm:$0xff] }
  0x8c   : > { %1176 = vst [vmem:[%s3078_s26 + $0x740] sm:$0xff] %v1175_v40  ;;  %1178 = vst [vmem:[%s3078_s26 + $0x748] sm:$0xff] %v1177_v41  ;;  %v1181_v43 = vld [vmem:[%s3073_s25 + $0xe18] sm:$0xff]  ;;  %v1183_v44 = vld [vmem:[%s3073_s25 + $0xe20] sm:$0xff] }
  0x8d   : > { %1180 = vst [vmem:[%s3078_s26 + $0x750] sm:$0xff] %v1179_v42  ;;  %1182 = vst [vmem:[%s3078_s26 + $0x758] sm:$0xff] %v1181_v43  ;;  %v1185_v45 = vld [vmem:[%s3073_s25 + $0xe28] sm:$0xff]  ;;  %v1187_v46 = vld [vmem:[%s3073_s25 + $0xe30] sm:$0xff] }
  0x8e   : > { %1184 = vst [vmem:[%s3078_s26 + $0x760] sm:$0xff] %v1183_v44  ;;  %v1189_v47 = vld [vmem:[%s3073_s25 + $0xe38] sm:$0xff]  ;;  %1186 = vst [vmem:[%s3078_s26 + $0x768] sm:$0xff] %v1185_v45  ;;  %v1191_v48 = vld [vmem:[%s3073_s25 + $0xf00] sm:$0xff] }
  0x8f   : > { %1188 = vst [vmem:[%s3078_s26 + $0x770] sm:$0xff] %v1187_v46  ;;  %1190 = vst [vmem:[%s3078_s26 + $0x778] sm:$0xff] %v1189_v47  ;;  %v1193_v49 = vld [vmem:[%s3073_s25 + $0xf08] sm:$0xff]  ;;  %v1195_v50 = vld [vmem:[%s3073_s25 + $0xf10] sm:$0xff] }
  0x90   : > { %1192 = vst [vmem:[%s3078_s26 + $0x780] sm:$0xff] %v1191_v48  ;;  %1194 = vst [vmem:[%s3078_s26 + $0x788] sm:$0xff] %v1193_v49  ;;  %v1197_v51 = vld [vmem:[%s3073_s25 + $0xf18] sm:$0xff]  ;;  %v1199_v52 = vld [vmem:[%s3073_s25 + $0xf20] sm:$0xff] }
  0x91   : > { %1196 = vst [vmem:[%s3078_s26 + $0x790] sm:$0xff] %v1195_v50  ;;  %v1201_v53 = vld [vmem:[%s3073_s25 + $0xf28] sm:$0xff]  ;;  %1198 = vst [vmem:[%s3078_s26 + $0x798] sm:$0xff] %v1197_v51  ;;  %v1203_v54 = vld [vmem:[%s3073_s25 + $0xf30] sm:$0xff] }
  0x92   : > { %1200 = vst [vmem:[%s3078_s26 + $0x7a0] sm:$0xff] %v1199_v52  ;;  %1202 = vst [vmem:[%s3078_s26 + $0x7a8] sm:$0xff] %v1201_v53  ;;  %v1205_v55 = vld [vmem:[%s3073_s25 + $0xf38] sm:$0xff]  ;;  %v1207_v56 = vld [vmem:[%s3073_s25 + $0xf40] sm:$0xff] }
  0x93   : > { %1204 = vst [vmem:[%s3078_s26 + $0x7b0] sm:$0xff] %v1203_v54  ;;  %1206 = vst [vmem:[%s3078_s26 + $0x7b8] sm:$0xff] %v1205_v55  ;;  %v1209_v57 = vld [vmem:[%s3073_s25 + $0xf48] sm:$0xff]  ;;  %v1211_v58 = vld [vmem:[%s3073_s25 + $0xf50] sm:$0xff] }
  0x94   : > { %1208 = vst [vmem:[%s3078_s26 + $0x7c0] sm:$0xff] %v1207_v56  ;;  %v1213_v59 = vld [vmem:[%s3073_s25 + $0xf58] sm:$0xff]  ;;  %1210 = vst [vmem:[%s3078_s26 + $0x7c8] sm:$0xff] %v1209_v57  ;;  %v1215_v60 = vld [vmem:[%s3073_s25 + $0xf60] sm:$0xff] }
  0x95   : > { %1212 = vst [vmem:[%s3078_s26 + $0x7d0] sm:$0xff] %v1211_v58  ;;  %1214 = vst [vmem:[%s3078_s26 + $0x7d8] sm:$0xff] %v1213_v59  ;;  %v1217_v61 = vld [vmem:[%s3073_s25 + $0xf68] sm:$0xff]  ;;  %v1219_v62 = vld [vmem:[%s3073_s25 + $0xf70] sm:$0xff] }
  0x96   : > { %1216 = vst [vmem:[%s3078_s26 + $0x7e0] sm:$0xff] %v1215_v60  ;;  %1218 = vst [vmem:[%s3078_s26 + $0x7e8] sm:$0xff] %v1217_v61  ;;  %v1221_v63 = vld [vmem:[%s3073_s25 + $0xf78] sm:$0xff]  ;;  %v1223_v0 = vld [vmem:[%s3073_s25 + $0xf80] sm:$0xff] }
  0x97   : > { %1220 = vst [vmem:[%s3078_s26 + $0x7f0] sm:$0xff] %v1219_v62  ;;  %v1225_v1 = vld [vmem:[%s3073_s25 + $0xf88] sm:$0xff]  ;;  %1222 = vst [vmem:[%s3078_s26 + $0x7f8] sm:$0xff] %v1221_v63  ;;  %v1227_v2 = vld [vmem:[%s3073_s25 + $0xf90] sm:$0xff] }
  0x98   : > { %1224 = vst [vmem:[%s3078_s26 + $0x800] sm:$0xff] %v1223_v0  ;;  %1226 = vst [vmem:[%s3078_s26 + $0x808] sm:$0xff] %v1225_v1  ;;  %v1229_v3 = vld [vmem:[%s3073_s25 + $0xf98] sm:$0xff]  ;;  %v1231_v4 = vld [vmem:[%s3073_s25 + $0xfa0] sm:$0xff] }
  0x99   : > { %1228 = vst [vmem:[%s3078_s26 + $0x810] sm:$0xff] %v1227_v2  ;;  %1230 = vst [vmem:[%s3078_s26 + $0x818] sm:$0xff] %v1229_v3  ;;  %v1233_v5 = vld [vmem:[%s3073_s25 + $0xfa8] sm:$0xff]  ;;  %v1235_v6 = vld [vmem:[%s3073_s25 + $0xfb0] sm:$0xff] }
  0x9a   : > { %1232 = vst [vmem:[%s3078_s26 + $0x820] sm:$0xff] %v1231_v4  ;;  %v1237_v7 = vld [vmem:[%s3073_s25 + $0xfb8] sm:$0xff]  ;;  %1234 = vst [vmem:[%s3078_s26 + $0x828] sm:$0xff] %v1233_v5  ;;  %v1239_v8 = vld [vmem:[%s3073_s25 + $0x1080] sm:$0xff] }
  0x9b   : > { %1236 = vst [vmem:[%s3078_s26 + $0x830] sm:$0xff] %v1235_v6  ;;  %1238 = vst [vmem:[%s3078_s26 + $0x838] sm:$0xff] %v1237_v7  ;;  %v1241_v9 = vld [vmem:[%s3073_s25 + $0x1088] sm:$0xff]  ;;  %v1243_v10 = vld [vmem:[%s3073_s25 + $0x1090] sm:$0xff] }
  0x9c   : > { %1240 = vst [vmem:[%s3078_s26 + $0x840] sm:$0xff] %v1239_v8  ;;  %1242 = vst [vmem:[%s3078_s26 + $0x848] sm:$0xff] %v1241_v9  ;;  %v1245_v11 = vld [vmem:[%s3073_s25 + $0x1098] sm:$0xff]  ;;  %v1247_v12 = vld [vmem:[%s3073_s25 + $0x10a0] sm:$0xff] }
  0x9d   : > { %1244 = vst [vmem:[%s3078_s26 + $0x850] sm:$0xff] %v1243_v10  ;;  %v1249_v13 = vld [vmem:[%s3073_s25 + $0x10a8] sm:$0xff]  ;;  %1246 = vst [vmem:[%s3078_s26 + $0x858] sm:$0xff] %v1245_v11  ;;  %v1251_v14 = vld [vmem:[%s3073_s25 + $0x10b0] sm:$0xff] }
  0x9e   : > { %1248 = vst [vmem:[%s3078_s26 + $0x860] sm:$0xff] %v1247_v12  ;;  %1250 = vst [vmem:[%s3078_s26 + $0x868] sm:$0xff] %v1249_v13  ;;  %v1253_v15 = vld [vmem:[%s3073_s25 + $0x10b8] sm:$0xff]  ;;  %v1255_v16 = vld [vmem:[%s3073_s25 + $0x10c0] sm:$0xff] }
  0x9f   : > { %1252 = vst [vmem:[%s3078_s26 + $0x870] sm:$0xff] %v1251_v14  ;;  %1254 = vst [vmem:[%s3078_s26 + $0x878] sm:$0xff] %v1253_v15  ;;  %v1257_v17 = vld [vmem:[%s3073_s25 + $0x10c8] sm:$0xff]  ;;  %v1259_v18 = vld [vmem:[%s3073_s25 + $0x10d0] sm:$0xff] }
  0xa0   : > { %1256 = vst [vmem:[%s3078_s26 + $0x880] sm:$0xff] %v1255_v16  ;;  %v1261_v19 = vld [vmem:[%s3073_s25 + $0x10d8] sm:$0xff]  ;;  %1258 = vst [vmem:[%s3078_s26 + $0x888] sm:$0xff] %v1257_v17  ;;  %v1263_v20 = vld [vmem:[%s3073_s25 + $0x10e0] sm:$0xff] }
  0xa1   : > { %1260 = vst [vmem:[%s3078_s26 + $0x890] sm:$0xff] %v1259_v18  ;;  %1262 = vst [vmem:[%s3078_s26 + $0x898] sm:$0xff] %v1261_v19  ;;  %v1265_v21 = vld [vmem:[%s3073_s25 + $0x10e8] sm:$0xff]  ;;  %v1267_v22 = vld [vmem:[%s3073_s25 + $0x10f0] sm:$0xff] }
  0xa2   : > { %1264 = vst [vmem:[%s3078_s26 + $0x8a0] sm:$0xff] %v1263_v20  ;;  %1266 = vst [vmem:[%s3078_s26 + $0x8a8] sm:$0xff] %v1265_v21  ;;  %v1269_v23 = vld [vmem:[%s3073_s25 + $0x10f8] sm:$0xff]  ;;  %v1271_v24 = vld [vmem:[%s3073_s25 + $0x1100] sm:$0xff] }
  0xa3   : > { %1268 = vst [vmem:[%s3078_s26 + $0x8b0] sm:$0xff] %v1267_v22  ;;  %v1273_v25 = vld [vmem:[%s3073_s25 + $0x1108] sm:$0xff]  ;;  %1270 = vst [vmem:[%s3078_s26 + $0x8b8] sm:$0xff] %v1269_v23  ;;  %v1275_v26 = vld [vmem:[%s3073_s25 + $0x1110] sm:$0xff] }
  0xa4   : > { %1272 = vst [vmem:[%s3078_s26 + $0x8c0] sm:$0xff] %v1271_v24  ;;  %1274 = vst [vmem:[%s3078_s26 + $0x8c8] sm:$0xff] %v1273_v25  ;;  %v1277_v27 = vld [vmem:[%s3073_s25 + $0x1118] sm:$0xff]  ;;  %v1279_v28 = vld [vmem:[%s3073_s25 + $0x1120] sm:$0xff] }
  0xa5   : > { %1276 = vst [vmem:[%s3078_s26 + $0x8d0] sm:$0xff] %v1275_v26  ;;  %1278 = vst [vmem:[%s3078_s26 + $0x8d8] sm:$0xff] %v1277_v27  ;;  %v1281_v29 = vld [vmem:[%s3073_s25 + $0x1128] sm:$0xff]  ;;  %v1283_v30 = vld [vmem:[%s3073_s25 + $0x1130] sm:$0xff] }
  0xa6   : > { %1280 = vst [vmem:[%s3078_s26 + $0x8e0] sm:$0xff] %v1279_v28  ;;  %v1285_v31 = vld [vmem:[%s3073_s25 + $0x1138] sm:$0xff]  ;;  %1282 = vst [vmem:[%s3078_s26 + $0x8e8] sm:$0xff] %v1281_v29 }
  0xa7   : > { %1284 = vst [vmem:[%s3078_s26 + $0x8f0] sm:$0xff] %v1283_v30  ;;  %1286 = vst [vmem:[%s3078_s26 + $0x8f8] sm:$0xff] %v1285_v31 }
  0xa8 PF: > { %p2587_p11 = scmp.ge.s32.totalorder %s2995_s11, 1  ;;  %p1291_p12 = scmp.lt.s32.totalorder %s2995_s11, 3 }
  0xaa   : > { %p1292_p13 = pnand %p2587_p11, %p1291_p12 }
  0xab   : > { %s3656_s27 = sand.u32 (!%p1292_p13), 1, %s2979_s7   ;;  %s2997_s30 = smov (!%p1292_p13), 64  }
  0xac   : > { %1295 = sbr.rel (%p1292_p13) target bundleno = 592 (0x250), region = 58  ;;  %s2998_s20 = smov (!%p1292_p13), [#allocation3]  }
  0xad   : > { %s2857_s28 = smul.u32 (!%p1292_p13), 2304, %s3656_s27  ;;  %s2923_s21 = sshll.u32 (!%p1292_p13), %s2998_s20, 4  ;;  %s2924_s21 = int_to_ptr.vmem [resolvable:$false] %s2923_s21 }
  0xae   : > { %s2858_s2 = smul.u32 (!%p1292_p13), 1152, %s3656_s27  ;;  %s2925_s22 = scalar_lea.vmem (!%p1292_p13), %s2924_s21, 36864 }
  0xaf   : > { %s3659_s29 = scalar_lea.vmem (!%p1292_p13), [#allocation2], %s2857_s28  ;;  %s2866_s4 = smul.u32 (!%p1292_p13), 18432, %s2987_s9 }
  0xb0   : > { %s3784_s3 = scalar_lea.vmem (!%p1292_p13), [#allocation3], %s2858_s2  ;;  %s2484_s9 = scalar_lea.sflag (!%p1292_p13), [#allocation4], %s3656_s27 }
  0xb1   : > { %v2590_v32 = vld [vmem:[%s3659_s29 + $0xd0] sm:$0xff]  ;;  %v2588_v33 = vld [vmem:[%s3659_s29 + $0xc0] sm:$0xff]  ;;  %v2591_v34 = vld [vmem:[%s3659_s29 + $0xd8] sm:$0xff]  ;;  %vm1464_vm0 = vcmask 523264   ;;  %s2500_s5 = sshll.u32 %s3784_s3, 4  ;;  %s4385_s15 = scalar_lea.hbm %s4440_s1, %s2866_s4  ;;  %s4387_s5 = int_to_ptr.vmem [resolvable:$true] %s2500_s5 }
  0xb2   : > { %1396 = vrot.lane.b32.xlu1 %v2590_v32, %s2997_s30  ;;  %1392 = vrot.lane.b32.xlu0 %v2588_v33, %s2997_s30  ;;  %v2589_v35 = vld [vmem:[%s3659_s29 + $0xc8] sm:$0xff]  ;;  %v2592_v37 = vld [vmem:[%s3659_s29 + $0xe0] sm:$0xff]  ;;  %s2919_s17 = scalar_lea.vmem %s4387_s5, 18432  ;;  %p2926_p3 = scmp.lt.s32.totalorder %s4387_s5, %s2924_s21 }
  0xb3   : > { %v2593_v36 = vld [vmem:[%s3659_s29 + $0xe8] sm:$0xff]  ;;  %v2595_v38 = vld [vmem:[%s3659_s29 + $0xf8] sm:$0xff]  ;;  %v2594_v39 = vld [vmem:[%s3659_s29 + $0xf0] sm:$0xff]  ;;  %p2920_p0 = scmp.ne.s32.totalorder %s4387_s5, %s2919_s17  ;;  %p2927_p4 = scmp.lt.s32.totalorder %s2925_s22, %s2919_s17 }
  0xb4   : > { %v2597_v40 = vld [vmem:[%s3659_s29 + $0x108] sm:$0xff]  ;;  %v2596_v41 = vld [vmem:[%s3659_s29 + $0x100] sm:$0xff]  ;;  %v2599_v42 = vld [vmem:[%s3659_s29 + $0x118] sm:$0xff] }
  0xb5   : > { %v2598_v43 = vld [vmem:[%s3659_s29 + $0x110] sm:$0xff]  ;;  %v2601_v44 = vld [vmem:[%s3659_s29 + $0x128] sm:$0xff]  ;;  %v2600_v45 = vld [vmem:[%s3659_s29 + $0x120] sm:$0xff]  ;;  %p2921_p1 = pnand %p2920_p0, %p3050_p5  ;;  %p2928_p6 = por %p2927_p4, %p2926_p3 }
  0xb6   : > { %1398 = vrot.lane.b32.xlu1 %v2591_v34, %s2997_s30  ;;  %1394 = vrot.lane.b32.xlu0 %v2589_v35, %s2997_s30  ;;  %v2603_v46 = vld [vmem:[%s3659_s29 + $0x138] sm:$0xff]  ;;  %v2602_v47 = vld [vmem:[%s3659_s29 + $0x130] sm:$0xff] }
  0xb7   : > { %v2605_v48 = vld [vmem:[%s3659_s29 + $0x148] sm:$0xff]  ;;  %v2604_v49 = vld [vmem:[%s3659_s29 + $0x140] sm:$0xff]  ;;  %v2607_v50 = vld [vmem:[%s3659_s29 + $0x158] sm:$0xff]  ;;  %p2922_p2 = pneg %p2921_p1 }
  0xb8   : > { %v2606_v51 = vld [vmem:[%s3659_s29 + $0x150] sm:$0xff]  ;;  %v2609_v52 = vld [vmem:[%s3659_s29 + $0x168] sm:$0xff]  ;;  %v2608_v53 = vld [vmem:[%s3659_s29 + $0x160] sm:$0xff] }
  0xb9   : > { %v2611_v54 = vld [vmem:[%s3659_s29 + $0x178] sm:$0xff]  ;;  %v2610_v55 = vld [vmem:[%s3659_s29 + $0x170] sm:$0xff]  ;;  %v2637_v56 = vld [vmem:[%s3659_s29 + $0x248] sm:$0xff]  ;;  %p2929_p7 = pnand %p2928_p6, %p2922_p2 }
  0xba   : > { %1402 = vrot.lane.b32.xlu1 %v2593_v36, %s2997_s30  ;;  %1400 = vrot.lane.b32.xlu0 %v2592_v37, %s2997_s30  ;;  %v2636_v57 = vld [vmem:[%s3659_s29 + $0x240] sm:$0xff]  ;;  %v2639_v58 = vld [vmem:[%s3659_s29 + $0x258] sm:$0xff] }
  0xbb   : > { %v2638_v59 = vld [vmem:[%s3659_s29 + $0x250] sm:$0xff]  ;;  %v2641_v60 = vld [vmem:[%s3659_s29 + $0x268] sm:$0xff]  ;;  %v2640_v61 = vld [vmem:[%s3659_s29 + $0x260] sm:$0xff] }
  0xbc   : > { %v2643_v62 = vld [vmem:[%s3659_s29 + $0x278] sm:$0xff]  ;;  %v2642_v63 = vld [vmem:[%s3659_s29 + $0x270] sm:$0xff]  ;;  %v2645_v0 = vld [vmem:[%s3659_s29 + $0x288] sm:$0xff] }
  0xbd   : > { %v2644_v1 = vld [vmem:[%s3659_s29 + $0x280] sm:$0xff]  ;;  %v2647_v2 = vld [vmem:[%s3659_s29 + $0x298] sm:$0xff]  ;;  %v2646_v3 = vld [vmem:[%s3659_s29 + $0x290] sm:$0xff] }
  0xbe   : > { %1406 = vrot.lane.b32.xlu1 %v2595_v38, %s2997_s30  ;;  %1404 = vrot.lane.b32.xlu0 %v2594_v39, %s2997_s30  ;;  %v2649_v4 = vld [vmem:[%s3659_s29 + $0x2a8] sm:$0xff]  ;;  %v2648_v5 = vld [vmem:[%s3659_s29 + $0x2a0] sm:$0xff] }
  0xbf   : > { %v2651_v6 = vld [vmem:[%s3659_s29 + $0x2b8] sm:$0xff]  ;;  %v2650_v7 = vld [vmem:[%s3659_s29 + $0x2b0] sm:$0xff]  ;;  %v2653_v8 = vld [vmem:[%s3659_s29 + $0x2c8] sm:$0xff] }
  0xc0   : > { %v2652_v9 = vld [vmem:[%s3659_s29 + $0x2c0] sm:$0xff]  ;;  %v2655_v10 = vld [vmem:[%s3659_s29 + $0x2d8] sm:$0xff]  ;;  %v2654_v11 = vld [vmem:[%s3659_s29 + $0x2d0] sm:$0xff] }
  0xc1   : > { %v2657_v12 = vld [vmem:[%s3659_s29 + $0x2e8] sm:$0xff]  ;;  %v2656_v13 = vld [vmem:[%s3659_s29 + $0x2e0] sm:$0xff]  ;;  %v2659_v14 = vld [vmem:[%s3659_s29 + $0x2f8] sm:$0xff] }
  0xc2   : > { %1410 = vrot.lane.b32.xlu1 %v2597_v40, %s2997_s30  ;;  %1408 = vrot.lane.b32.xlu0 %v2596_v41, %s2997_s30  ;;  %v2658_v15 = vld [vmem:[%s3659_s29 + $0x2f0] sm:$0xff]  ;;  %v2685_v16 = vld [vmem:[%s3659_s29 + $0x3c8] sm:$0xff] }
  0xc3   : > { %v2684_v17 = vld [vmem:[%s3659_s29 + $0x3c0] sm:$0xff]  ;;  %v2687_v18 = vld [vmem:[%s3659_s29 + $0x3d8] sm:$0xff]  ;;  %v2686_v19 = vld [vmem:[%s3659_s29 + $0x3d0] sm:$0xff] }
  0xc4   : > { %v2689_v20 = vld [vmem:[%s3659_s29 + $0x3e8] sm:$0xff]  ;;  %v2688_v21 = vld [vmem:[%s3659_s29 + $0x3e0] sm:$0xff]  ;;  %v2691_v22 = vld [vmem:[%s3659_s29 + $0x3f8] sm:$0xff] }
  0xc5   : > { %v2690_v23 = vld [vmem:[%s3659_s29 + $0x3f0] sm:$0xff]  ;;  %v2693_v24 = vld [vmem:[%s3659_s29 + $0x408] sm:$0xff]  ;;  %v2692_v25 = vld [vmem:[%s3659_s29 + $0x400] sm:$0xff] }
  0xc6   : > { %1414 = vrot.lane.b32.xlu1 %v2599_v42, %s2997_s30  ;;  %1412 = vrot.lane.b32.xlu0 %v2598_v43, %s2997_s30  ;;  %v1321_v26 = vld [vmem:[%s3659_s29 + $0x10] sm:$0xff]  ;;  %v1319_v27 = vld [vmem:[%s3659_s29] sm:$0xff] }
  0xc7   : > { %v2695_v28 = vld [vmem:[%s3659_s29 + $0x418] sm:$0xff]  ;;  %v2694_v29 = vld [vmem:[%s3659_s29 + $0x410] sm:$0xff]  ;;  %v1320_v35 = vld [vmem:[%s3659_s29 + $0x8] sm:$0xff] }
  0xc8   : > { %v1322_v34 = vld [vmem:[%s3659_s29 + $0x18] sm:$0xff]  ;;  %v2697_v36 = vld [vmem:[%s3659_s29 + $0x428] sm:$0xff]  ;;  %v2696_v37 = vld [vmem:[%s3659_s29 + $0x420] sm:$0xff] }
  0xc9   : > { %v1324_v42 = vld [vmem:[%s3659_s29 + $0x28] sm:$0xff]  ;;  %v1323_v43 = vld [vmem:[%s3659_s29 + $0x20] sm:$0xff] }
  0xca   : > { %1418 = vrot.lane.b32.xlu1 %v2601_v44, %s2997_s30  ;;  %1416 = vrot.lane.b32.xlu0 %v2600_v45, %s2997_s30  ;;  %v2699_v44 = vld [vmem:[%s3659_s29 + $0x438] sm:$0xff]  ;;  %v2698_v45 = vld [vmem:[%s3659_s29 + $0x430] sm:$0xff] }
  0xce   : > { %1422 = vrot.lane.b32.xlu1 %v2603_v46, %s2997_s30  ;;  %1420 = vrot.lane.b32.xlu0 %v2602_v47, %s2997_s30 }
  0xd2   : > { %1426 = vrot.lane.b32.xlu1 %v2605_v48, %s2997_s30  ;;  %1424 = vrot.lane.b32.xlu0 %v2604_v49, %s2997_s30 }
  0xd6   : > { %1430 = vrot.lane.b32.xlu1 %v2607_v50, %s2997_s30  ;;  %1428 = vrot.lane.b32.xlu0 %v2606_v51, %s2997_s30  ;;  %v1326_v50 = vld [vmem:[%s3659_s29 + $0x38] sm:$0xff]  ;;  %v1325_v51 = vld [vmem:[%s3659_s29 + $0x30] sm:$0xff] }
  0xda   : > { %1434 = vrot.lane.b32.xlu1 %v2609_v52, %s2997_s30  ;;  %1432 = vrot.lane.b32.xlu0 %v2608_v53, %s2997_s30  ;;  %v2701_v52 = vld [vmem:[%s3659_s29 + $0x448] sm:$0xff]  ;;  %v2700_v53 = vld [vmem:[%s3659_s29 + $0x440] sm:$0xff] }
  0xde   : > { %1438 = vrot.lane.b32.xlu1 %v2611_v54, %s2997_s30  ;;  %1436 = vrot.lane.b32.xlu0 %v2610_v55, %s2997_s30 }
  0xe2   : > { %1589 = vrot.lane.b32.xlu1 %v2637_v56, %s2997_s30  ;;  %1587 = vrot.lane.b32.xlu0 %v2636_v57, %s2997_s30 }
  0xe6   : > { %1593 = vrot.lane.b32.xlu1 %v2639_v58, %s2997_s30  ;;  %1591 = vrot.lane.b32.xlu0 %v2638_v59, %s2997_s30  ;;  %v1328_v58 = vld [vmem:[%s3659_s29 + $0x48] sm:$0xff]  ;;  %v1327_v59 = vld [vmem:[%s3659_s29 + $0x40] sm:$0xff] }
  0xea   : > { %1597 = vrot.lane.b32.xlu1 %v2641_v60, %s2997_s30  ;;  %1595 = vrot.lane.b32.xlu0 %v2640_v61, %s2997_s30  ;;  %v2703_v60 = vld [vmem:[%s3659_s29 + $0x458] sm:$0xff]  ;;  %v2702_v61 = vld [vmem:[%s3659_s29 + $0x450] sm:$0xff] }
  0xee   : > { %1601 = vrot.lane.b32.xlu1 %v2643_v62, %s2997_s30  ;;  %1599 = vrot.lane.b32.xlu0 %v2642_v63, %s2997_s30 }
  0xf2   : > { %1605 = vrot.lane.b32.xlu1 %v2645_v0, %s2997_s30  ;;  %1603 = vrot.lane.b32.xlu0 %v2644_v1, %s2997_s30 }
  0xf6   : > { %1609 = vrot.lane.b32.xlu1 %v2647_v2, %s2997_s30  ;;  %1607 = vrot.lane.b32.xlu0 %v2646_v3, %s2997_s30  ;;  %v1330_v2 = vld [vmem:[%s3659_s29 + $0x58] sm:$0xff]  ;;  %v1329_v3 = vld [vmem:[%s3659_s29 + $0x50] sm:$0xff] }
  0xfa   : > { %1613 = vrot.lane.b32.xlu1 %v2649_v4, %s2997_s30  ;;  %1611 = vrot.lane.b32.xlu0 %v2648_v5, %s2997_s30  ;;  %v2705_v4 = vld [vmem:[%s3659_s29 + $0x468] sm:$0xff]  ;;  %v2704_v5 = vld [vmem:[%s3659_s29 + $0x460] sm:$0xff] }
  0xfe   : > { %1617 = vrot.lane.b32.xlu1 %v2651_v6, %s2997_s30  ;;  %1615 = vrot.lane.b32.xlu0 %v2650_v7, %s2997_s30 }
 0x102   : > { %1621 = vrot.lane.b32.xlu1 %v2653_v8, %s2997_s30  ;;  %1619 = vrot.lane.b32.xlu0 %v2652_v9, %s2997_s30 }
 0x106   : > { %1625 = vrot.lane.b32.xlu1 %v2655_v10, %s2997_s30  ;;  %1623 = vrot.lane.b32.xlu0 %v2654_v11, %s2997_s30  ;;  %v1332_v10 = vld [vmem:[%s3659_s29 + $0x68] sm:$0xff]  ;;  %v1331_v11 = vld [vmem:[%s3659_s29 + $0x60] sm:$0xff] }
 0x10a   : > { %1629 = vrot.lane.b32.xlu1 %v2657_v12, %s2997_s30  ;;  %1627 = vrot.lane.b32.xlu0 %v2656_v13, %s2997_s30  ;;  %v2707_v12 = vld [vmem:[%s3659_s29 + $0x478] sm:$0xff]  ;;  %v2706_v13 = vld [vmem:[%s3659_s29 + $0x470] sm:$0xff] }
 0x10e   : > { %1633 = vrot.lane.b32.xlu1 %v2659_v14, %s2997_s30  ;;  %1631 = vrot.lane.b32.xlu0 %v2658_v15, %s2997_s30 }
 0x112   : > { %1783 = vrot.lane.b32.xlu1 %v2685_v16, %s2997_s30  ;;  %1781 = vrot.lane.b32.xlu0 %v2684_v17, %s2997_s30 }
 0x116   : > { %1787 = vrot.lane.b32.xlu1 %v2687_v18, %s2997_s30  ;;  %1785 = vrot.lane.b32.xlu0 %v2686_v19, %s2997_s30  ;;  %v1334_v18 = vld [vmem:[%s3659_s29 + $0x78] sm:$0xff]  ;;  %v1333_v19 = vld [vmem:[%s3659_s29 + $0x70] sm:$0xff] }
 0x11a   : > { %1791 = vrot.lane.b32.xlu1 %v2689_v20, %s2997_s30  ;;  %1789 = vrot.lane.b32.xlu0 %v2688_v21, %s2997_s30  ;;  %v2733_v20 = vld [vmem:[%s3659_s29 + $0x548] sm:$0xff]  ;;  %v2732_v21 = vld [vmem:[%s3659_s29 + $0x540] sm:$0xff] }
 0x11e   : > { %1795 = vrot.lane.b32.xlu1 %v2691_v22, %s2997_s30  ;;  %1793 = vrot.lane.b32.xlu0 %v2690_v23, %s2997_s30 }
 0x122   : > { %1799 = vrot.lane.b32.xlu1 %v2693_v24, %s2997_s30  ;;  %1797 = vrot.lane.b32.xlu0 %v2692_v25, %s2997_s30 }
 0x124   : > { %v1397_v30 = vpop.permute.xlu1 %1396  ;;  %v1393_v31 = vpop.permute.xlu0 %1392 }
 0x125   : > { %v1467_v32 = vsel %vm1464_vm0, %v1321_v26, %v1397_v30  ;;  %v1465_v33 = vsel %vm1464_vm0, %v1319_v27, %v1393_v31  ;;  %v1336_v26 = vld [vmem:[%s3659_s29 + $0x88] sm:$0xff]  ;;  %v1335_v27 = vld [vmem:[%s3659_s29 + $0x80] sm:$0xff] }
 0x126   : > { %1491 = vst [vmem:[%s3784_s3 + $0x60] sm:$0xff] %v1467_v32  ;;  %1489 = vst [vmem:[%s3784_s3] sm:$0xff] %v1465_v33  ;;  %1803 = vrot.lane.b32.xlu1 %v2695_v28, %s2997_s30  ;;  %1801 = vrot.lane.b32.xlu0 %v2694_v29, %s2997_s30 }
 0x127   : > { %v2735_v28 = vld [vmem:[%s3659_s29 + $0x558] sm:$0xff]  ;;  %v2734_v29 = vld [vmem:[%s3659_s29 + $0x550] sm:$0xff] }
 0x128   : > { %v1399_v38 = vpop.permute.xlu1 %1398  ;;  %v1395_v39 = vpop.permute.xlu0 %1394 }
 0x129   : > { %v1468_v40 = vsel %vm1464_vm0, %v1322_v34, %v1399_v38  ;;  %v1466_v41 = vsel %vm1464_vm0, %v1320_v35, %v1395_v39  ;;  %v1338_v34 = vld [vmem:[%s3659_s29 + $0x98] sm:$0xff]  ;;  %v1337_v35 = vld [vmem:[%s3659_s29 + $0x90] sm:$0xff] }
 0x12a   : > { %1492 = vst [vmem:[%s3784_s3 + $0x90] sm:$0xff] %v1468_v40  ;;  %1490 = vst [vmem:[%s3784_s3 + $0x30] sm:$0xff] %v1466_v41  ;;  %1807 = vrot.lane.b32.xlu1 %v2697_v36, %s2997_s30  ;;  %1805 = vrot.lane.b32.xlu0 %v2696_v37, %s2997_s30 }
 0x12b   : > { %v2737_v36 = vld [vmem:[%s3659_s29 + $0x568] sm:$0xff]  ;;  %v2736_v37 = vld [vmem:[%s3659_s29 + $0x560] sm:$0xff] }
 0x12c   : > { %v1403_v46 = vpop.permute.xlu1 %1402  ;;  %v1401_v47 = vpop.permute.xlu0 %1400 }
 0x12d   : > { %v1470_v48 = vsel %vm1464_vm0, %v1324_v42, %v1403_v46  ;;  %v1469_v49 = vsel %vm1464_vm0, %v1323_v43, %v1401_v47  ;;  %v1340_v42 = vld [vmem:[%s3659_s29 + $0xa8] sm:$0xff]  ;;  %v1339_v43 = vld [vmem:[%s3659_s29 + $0xa0] sm:$0xff] }
 0x12e   : > { %1494 = vst [vmem:[%s3784_s3 + $0xf0] sm:$0xff] %v1470_v48  ;;  %1493 = vst [vmem:[%s3784_s3 + $0xc0] sm:$0xff] %v1469_v49  ;;  %1811 = vrot.lane.b32.xlu1 %v2699_v44, %s2997_s30  ;;  %1809 = vrot.lane.b32.xlu0 %v2698_v45, %s2997_s30 }
 0x12f   : > { %v2739_v44 = vld [vmem:[%s3659_s29 + $0x578] sm:$0xff]  ;;  %v2738_v45 = vld [vmem:[%s3659_s29 + $0x570] sm:$0xff] }
 0x130   : > { %v1407_v54 = vpop.permute.xlu1 %1406  ;;  %v1405_v55 = vpop.permute.xlu0 %1404 }
 0x131   : > { %v1472_v56 = vsel %vm1464_vm0, %v1326_v50, %v1407_v54  ;;  %v1471_v57 = vsel %vm1464_vm0, %v1325_v51, %v1405_v55  ;;  %v1342_v50 = vld [vmem:[%s3659_s29 + $0xb8] sm:$0xff]  ;;  %v1341_v51 = vld [vmem:[%s3659_s29 + $0xb0] sm:$0xff] }
 0x132   : > { %1496 = vst [vmem:[%s3784_s3 + $0x150] sm:$0xff] %v1472_v56  ;;  %1495 = vst [vmem:[%s3784_s3 + $0x120] sm:$0xff] %v1471_v57  ;;  %1815 = vrot.lane.b32.xlu1 %v2701_v52, %s2997_s30  ;;  %1813 = vrot.lane.b32.xlu0 %v2700_v53, %s2997_s30 }
 0x133   : > { %v2741_v52 = vld [vmem:[%s3659_s29 + $0x588] sm:$0xff]  ;;  %v2740_v53 = vld [vmem:[%s3659_s29 + $0x580] sm:$0xff] }
 0x134   : > { %v1411_v62 = vpop.permute.xlu1 %1410  ;;  %v1409_v63 = vpop.permute.xlu0 %1408 }
 0x135   : > { %v1474_v0 = vsel %vm1464_vm0, %v1328_v58, %v1411_v62  ;;  %v1473_v1 = vsel %vm1464_vm0, %v1327_v59, %v1409_v63  ;;  %v2613_v58 = vld [vmem:[%s3659_s29 + $0x188] sm:$0xff]  ;;  %v2612_v59 = vld [vmem:[%s3659_s29 + $0x180] sm:$0xff] }
 0x136   : > { %1498 = vst [vmem:[%s3784_s3 + $0x1b0] sm:$0xff] %v1474_v0  ;;  %1497 = vst [vmem:[%s3784_s3 + $0x180] sm:$0xff] %v1473_v1  ;;  %1819 = vrot.lane.b32.xlu1 %v2703_v60, %s2997_s30  ;;  %1817 = vrot.lane.b32.xlu0 %v2702_v61, %s2997_s30 }
 0x137   : > { %v2743_v60 = vld [vmem:[%s3659_s29 + $0x598] sm:$0xff]  ;;  %v2742_v61 = vld [vmem:[%s3659_s29 + $0x590] sm:$0xff] }
 0x138   : > { %v1415_v6 = vpop.permute.xlu1 %1414  ;;  %v1413_v7 = vpop.permute.xlu0 %1412 }
 0x139   : > { %v1476_v8 = vsel %vm1464_vm0, %v1330_v2, %v1415_v6  ;;  %v1475_v9 = vsel %vm1464_vm0, %v1329_v3, %v1413_v7  ;;  %v2615_v2 = vld [vmem:[%s3659_s29 + $0x198] sm:$0xff]  ;;  %v2614_v3 = vld [vmem:[%s3659_s29 + $0x190] sm:$0xff] }
 0x13a   : > { %1500 = vst [vmem:[%s3784_s3 + $0x210] sm:$0xff] %v1476_v8  ;;  %1499 = vst [vmem:[%s3784_s3 + $0x1e0] sm:$0xff] %v1475_v9  ;;  %1823 = vrot.lane.b32.xlu1 %v2705_v4, %s2997_s30  ;;  %1821 = vrot.lane.b32.xlu0 %v2704_v5, %s2997_s30 }
 0x13b   : > { %v2745_v4 = vld [vmem:[%s3659_s29 + $0x5a8] sm:$0xff]  ;;  %v2744_v5 = vld [vmem:[%s3659_s29 + $0x5a0] sm:$0xff] }
 0x13c   : > { %v1419_v14 = vpop.permute.xlu1 %1418  ;;  %v1417_v15 = vpop.permute.xlu0 %1416 }
 0x13d   : > { %v1478_v16 = vsel %vm1464_vm0, %v1332_v10, %v1419_v14  ;;  %v1477_v17 = vsel %vm1464_vm0, %v1331_v11, %v1417_v15  ;;  %v2617_v10 = vld [vmem:[%s3659_s29 + $0x1a8] sm:$0xff]  ;;  %v2616_v11 = vld [vmem:[%s3659_s29 + $0x1a0] sm:$0xff] }
 0x13e   : > { %1502 = vst [vmem:[%s3784_s3 + $0x270] sm:$0xff] %v1478_v16  ;;  %1501 = vst [vmem:[%s3784_s3 + $0x240] sm:$0xff] %v1477_v17  ;;  %1827 = vrot.lane.b32.xlu1 %v2707_v12, %s2997_s30  ;;  %1825 = vrot.lane.b32.xlu0 %v2706_v13, %s2997_s30 }
 0x13f   : > { %v2747_v12 = vld [vmem:[%s3659_s29 + $0x5b8] sm:$0xff]  ;;  %v2746_v13 = vld [vmem:[%s3659_s29 + $0x5b0] sm:$0xff] }
 0x140   : > { %v1423_v22 = vpop.permute.xlu1 %1422  ;;  %v1421_v23 = vpop.permute.xlu0 %1420 }
 0x141   : > { %v1480_v24 = vsel %vm1464_vm0, %v1334_v18, %v1423_v22  ;;  %v1479_v25 = vsel %vm1464_vm0, %v1333_v19, %v1421_v23  ;;  %v2619_v18 = vld [vmem:[%s3659_s29 + $0x1b8] sm:$0xff]  ;;  %v2618_v19 = vld [vmem:[%s3659_s29 + $0x1b0] sm:$0xff] }
 0x142   : > { %1504 = vst [vmem:[%s3784_s3 + $0x2d0] sm:$0xff] %v1480_v24  ;;  %1503 = vst [vmem:[%s3784_s3 + $0x2a0] sm:$0xff] %v1479_v25  ;;  %1977 = vrot.lane.b32.xlu1 %v2733_v20, %s2997_s30  ;;  %1975 = vrot.lane.b32.xlu0 %v2732_v21, %s2997_s30 }
 0x143   : > { %v2749_v20 = vld [vmem:[%s3659_s29 + $0x5c8] sm:$0xff]  ;;  %v2748_v21 = vld [vmem:[%s3659_s29 + $0x5c0] sm:$0xff] }
 0x144   : > { %v1427_v30 = vpop.permute.xlu1 %1426  ;;  %v1425_v31 = vpop.permute.xlu0 %1424 }
 0x145   : > { %v1482_v32 = vsel %vm1464_vm0, %v1336_v26, %v1427_v30  ;;  %v1481_v33 = vsel %vm1464_vm0, %v1335_v27, %v1425_v31  ;;  %v2621_v26 = vld [vmem:[%s3659_s29 + $0x1c8] sm:$0xff]  ;;  %v2620_v27 = vld [vmem:[%s3659_s29 + $0x1c0] sm:$0xff] }
 0x146   : > { %1506 = vst [vmem:[%s3784_s3 + $0x330] sm:$0xff] %v1482_v32  ;;  %1505 = vst [vmem:[%s3784_s3 + $0x300] sm:$0xff] %v1481_v33  ;;  %1981 = vrot.lane.b32.xlu1 %v2735_v28, %s2997_s30  ;;  %1979 = vrot.lane.b32.xlu0 %v2734_v29, %s2997_s30 }
 0x147   : > { %v2751_v28 = vld [vmem:[%s3659_s29 + $0x5d8] sm:$0xff]  ;;  %v2750_v29 = vld [vmem:[%s3659_s29 + $0x5d0] sm:$0xff] }
 0x148   : > { %v1431_v38 = vpop.permute.xlu1 %1430  ;;  %v1429_v39 = vpop.permute.xlu0 %1428 }
 0x149   : > { %v1484_v40 = vsel %vm1464_vm0, %v1338_v34, %v1431_v38  ;;  %v1483_v41 = vsel %vm1464_vm0, %v1337_v35, %v1429_v39  ;;  %v2623_v34 = vld [vmem:[%s3659_s29 + $0x1d8] sm:$0xff]  ;;  %v2622_v35 = vld [vmem:[%s3659_s29 + $0x1d0] sm:$0xff] }
 0x14a   : > { %1508 = vst [vmem:[%s3784_s3 + $0x390] sm:$0xff] %v1484_v40  ;;  %1507 = vst [vmem:[%s3784_s3 + $0x360] sm:$0xff] %v1483_v41  ;;  %1985 = vrot.lane.b32.xlu1 %v2737_v36, %s2997_s30  ;;  %1983 = vrot.lane.b32.xlu0 %v2736_v37, %s2997_s30 }
 0x14b   : > { %v2753_v36 = vld [vmem:[%s3659_s29 + $0x5e8] sm:$0xff]  ;;  %v2752_v37 = vld [vmem:[%s3659_s29 + $0x5e0] sm:$0xff] }
 0x14c   : > { %v1435_v46 = vpop.permute.xlu1 %1434  ;;  %v1433_v47 = vpop.permute.xlu0 %1432 }
 0x14d   : > { %v1486_v48 = vsel %vm1464_vm0, %v1340_v42, %v1435_v46  ;;  %v1485_v49 = vsel %vm1464_vm0, %v1339_v43, %v1433_v47  ;;  %v2625_v42 = vld [vmem:[%s3659_s29 + $0x1e8] sm:$0xff]  ;;  %v2624_v43 = vld [vmem:[%s3659_s29 + $0x1e0] sm:$0xff] }
 0x14e   : > { %1510 = vst [vmem:[%s3784_s3 + $0x3f0] sm:$0xff] %v1486_v48  ;;  %1509 = vst [vmem:[%s3784_s3 + $0x3c0] sm:$0xff] %v1485_v49  ;;  %1989 = vrot.lane.b32.xlu1 %v2739_v44, %s2997_s30  ;;  %1987 = vrot.lane.b32.xlu0 %v2738_v45, %s2997_s30 }
 0x14f   : > { %v2755_v44 = vld [vmem:[%s3659_s29 + $0x5f8] sm:$0xff]  ;;  %v2754_v45 = vld [vmem:[%s3659_s29 + $0x5f0] sm:$0xff] }
 0x150   : > { %v1439_v54 = vpop.permute.xlu1 %1438  ;;  %v1437_v55 = vpop.permute.xlu0 %1436 }
 0x151   : > { %v1488_v56 = vsel %vm1464_vm0, %v1342_v50, %v1439_v54  ;;  %v1487_v57 = vsel %vm1464_vm0, %v1341_v51, %v1437_v55  ;;  %v2627_v50 = vld [vmem:[%s3659_s29 + $0x1f8] sm:$0xff]  ;;  %v2626_v51 = vld [vmem:[%s3659_s29 + $0x1f0] sm:$0xff] }
 0x152   : > { %1512 = vst [vmem:[%s3784_s3 + $0x450] sm:$0xff] %v1488_v56  ;;  %1511 = vst [vmem:[%s3784_s3 + $0x420] sm:$0xff] %v1487_v57  ;;  %1993 = vrot.lane.b32.xlu1 %v2741_v52, %s2997_s30  ;;  %1991 = vrot.lane.b32.xlu0 %v2740_v53, %s2997_s30 }
 0x153   : > { %v2781_v52 = vld [vmem:[%s3659_s29 + $0x6c8] sm:$0xff]  ;;  %v2780_v53 = vld [vmem:[%s3659_s29 + $0x6c0] sm:$0xff] }
 0x154   : > { %v1590_v62 = vpop.permute.xlu1 %1589  ;;  %v1588_v63 = vpop.permute.xlu0 %1587 }
 0x155   : > { %v1660_v0 = vsel %vm1464_vm0, %v2613_v58, %v1590_v62  ;;  %v1659_v1 = vsel %vm1464_vm0, %v2612_v59, %v1588_v63  ;;  %v2629_v58 = vld [vmem:[%s3659_s29 + $0x208] sm:$0xff]  ;;  %v2628_v59 = vld [vmem:[%s3659_s29 + $0x200] sm:$0xff] }
 0x156   : > { %1684 = vst [vmem:[%s3784_s3 + $0x38] sm:$0xff] %v1660_v0  ;;  %1683 = vst [vmem:[%s3784_s3 + $0x8] sm:$0xff] %v1659_v1  ;;  %1997 = vrot.lane.b32.xlu1 %v2743_v60, %s2997_s30  ;;  %1995 = vrot.lane.b32.xlu0 %v2742_v61, %s2997_s30 }
 0x157   : > { %v2783_v60 = vld [vmem:[%s3659_s29 + $0x6d8] sm:$0xff]  ;;  %v2782_v61 = vld [vmem:[%s3659_s29 + $0x6d0] sm:$0xff] }
 0x158   : > { %v1594_v6 = vpop.permute.xlu1 %1593  ;;  %v1592_v7 = vpop.permute.xlu0 %1591 }
 0x159   : > { %v1662_v8 = vsel %vm1464_vm0, %v2615_v2, %v1594_v6  ;;  %v1661_v9 = vsel %vm1464_vm0, %v2614_v3, %v1592_v7  ;;  %v2631_v2 = vld [vmem:[%s3659_s29 + $0x218] sm:$0xff]  ;;  %v2630_v3 = vld [vmem:[%s3659_s29 + $0x210] sm:$0xff] }
 0x15a   : > { %1686 = vst [vmem:[%s3784_s3 + $0x98] sm:$0xff] %v1662_v8  ;;  %1685 = vst [vmem:[%s3784_s3 + $0x68] sm:$0xff] %v1661_v9  ;;  %2001 = vrot.lane.b32.xlu1 %v2745_v4, %s2997_s30  ;;  %1999 = vrot.lane.b32.xlu0 %v2744_v5, %s2997_s30 }
 0x15b   : > { %v2785_v4 = vld [vmem:[%s3659_s29 + $0x6e8] sm:$0xff]  ;;  %v2784_v5 = vld [vmem:[%s3659_s29 + $0x6e0] sm:$0xff] }
 0x15c   : > { %v1598_v14 = vpop.permute.xlu1 %1597  ;;  %v1596_v15 = vpop.permute.xlu0 %1595 }
 0x15d   : > { %v1664_v16 = vsel %vm1464_vm0, %v2617_v10, %v1598_v14  ;;  %v1663_v17 = vsel %vm1464_vm0, %v2616_v11, %v1596_v15  ;;  %v2633_v10 = vld [vmem:[%s3659_s29 + $0x228] sm:$0xff]  ;;  %v2632_v11 = vld [vmem:[%s3659_s29 + $0x220] sm:$0xff] }
 0x15e   : > { %1688 = vst [vmem:[%s3784_s3 + $0xf8] sm:$0xff] %v1664_v16  ;;  %1687 = vst [vmem:[%s3784_s3 + $0xc8] sm:$0xff] %v1663_v17  ;;  %2005 = vrot.lane.b32.xlu1 %v2747_v12, %s2997_s30  ;;  %2003 = vrot.lane.b32.xlu0 %v2746_v13, %s2997_s30 }
 0x15f   : > { %v2787_v12 = vld [vmem:[%s3659_s29 + $0x6f8] sm:$0xff]  ;;  %v2786_v13 = vld [vmem:[%s3659_s29 + $0x6f0] sm:$0xff] }
 0x160   : > { %v1602_v22 = vpop.permute.xlu1 %1601  ;;  %v1600_v23 = vpop.permute.xlu0 %1599 }
 0x161   : > { %v1666_v24 = vsel %vm1464_vm0, %v2619_v18, %v1602_v22  ;;  %v1665_v25 = vsel %vm1464_vm0, %v2618_v19, %v1600_v23  ;;  %v2635_v18 = vld [vmem:[%s3659_s29 + $0x238] sm:$0xff]  ;;  %v2634_v19 = vld [vmem:[%s3659_s29 + $0x230] sm:$0xff] }
 0x162   : > { %1690 = vst [vmem:[%s3784_s3 + $0x158] sm:$0xff] %v1666_v24  ;;  %1689 = vst [vmem:[%s3784_s3 + $0x128] sm:$0xff] %v1665_v25  ;;  %2009 = vrot.lane.b32.xlu1 %v2749_v20, %s2997_s30  ;;  %2007 = vrot.lane.b32.xlu0 %v2748_v21, %s2997_s30 }
 0x163   : > { %v2789_v20 = vld [vmem:[%s3659_s29 + $0x708] sm:$0xff]  ;;  %v2788_v21 = vld [vmem:[%s3659_s29 + $0x700] sm:$0xff] }
 0x164   : > { %v1606_v30 = vpop.permute.xlu1 %1605  ;;  %v1604_v31 = vpop.permute.xlu0 %1603 }
 0x165   : > { %v1668_v32 = vsel %vm1464_vm0, %v2621_v26, %v1606_v30  ;;  %v1667_v33 = vsel %vm1464_vm0, %v2620_v27, %v1604_v31  ;;  %v2661_v26 = vld [vmem:[%s3659_s29 + $0x308] sm:$0xff]  ;;  %v2660_v27 = vld [vmem:[%s3659_s29 + $0x300] sm:$0xff] }
 0x166   : > { %1692 = vst [vmem:[%s3784_s3 + $0x1b8] sm:$0xff] %v1668_v32  ;;  %1691 = vst [vmem:[%s3784_s3 + $0x188] sm:$0xff] %v1667_v33  ;;  %2013 = vrot.lane.b32.xlu1 %v2751_v28, %s2997_s30  ;;  %2011 = vrot.lane.b32.xlu0 %v2750_v29, %s2997_s30 }
 0x167   : > { %v2791_v28 = vld [vmem:[%s3659_s29 + $0x718] sm:$0xff]  ;;  %v2790_v29 = vld [vmem:[%s3659_s29 + $0x710] sm:$0xff] }
 0x168   : > { %v1610_v38 = vpop.permute.xlu1 %1609  ;;  %v1608_v39 = vpop.permute.xlu0 %1607 }
 0x169   : > { %v1670_v40 = vsel %vm1464_vm0, %v2623_v34, %v1610_v38  ;;  %v1669_v41 = vsel %vm1464_vm0, %v2622_v35, %v1608_v39  ;;  %v2663_v34 = vld [vmem:[%s3659_s29 + $0x318] sm:$0xff]  ;;  %v2662_v35 = vld [vmem:[%s3659_s29 + $0x310] sm:$0xff] }
 0x16a   : > { %1694 = vst [vmem:[%s3784_s3 + $0x218] sm:$0xff] %v1670_v40  ;;  %1693 = vst [vmem:[%s3784_s3 + $0x1e8] sm:$0xff] %v1669_v41  ;;  %2017 = vrot.lane.b32.xlu1 %v2753_v36, %s2997_s30  ;;  %2015 = vrot.lane.b32.xlu0 %v2752_v37, %s2997_s30 }
 0x16b   : > { %v2793_v36 = vld [vmem:[%s3659_s29 + $0x728] sm:$0xff]  ;;  %v2792_v37 = vld [vmem:[%s3659_s29 + $0x720] sm:$0xff] }
 0x16c   : > { %v1614_v46 = vpop.permute.xlu1 %1613  ;;  %v1612_v47 = vpop.permute.xlu0 %1611 }
 0x16d   : > { %v1672_v48 = vsel %vm1464_vm0, %v2625_v42, %v1614_v46  ;;  %v1671_v49 = vsel %vm1464_vm0, %v2624_v43, %v1612_v47  ;;  %v2665_v42 = vld [vmem:[%s3659_s29 + $0x328] sm:$0xff]  ;;  %v2664_v43 = vld [vmem:[%s3659_s29 + $0x320] sm:$0xff] }
 0x16e   : > { %1696 = vst [vmem:[%s3784_s3 + $0x278] sm:$0xff] %v1672_v48  ;;  %1695 = vst [vmem:[%s3784_s3 + $0x248] sm:$0xff] %v1671_v49  ;;  %2021 = vrot.lane.b32.xlu1 %v2755_v44, %s2997_s30  ;;  %2019 = vrot.lane.b32.xlu0 %v2754_v45, %s2997_s30 }
 0x16f   : > { %v2795_v44 = vld [vmem:[%s3659_s29 + $0x738] sm:$0xff]  ;;  %v2794_v45 = vld [vmem:[%s3659_s29 + $0x730] sm:$0xff] }
 0x170   : > { %v1618_v54 = vpop.permute.xlu1 %1617  ;;  %v1616_v55 = vpop.permute.xlu0 %1615 }
 0x171   : > { %v1674_v56 = vsel %vm1464_vm0, %v2627_v50, %v1618_v54  ;;  %v1673_v57 = vsel %vm1464_vm0, %v2626_v51, %v1616_v55  ;;  %v2667_v50 = vld [vmem:[%s3659_s29 + $0x338] sm:$0xff]  ;;  %v2666_v51 = vld [vmem:[%s3659_s29 + $0x330] sm:$0xff] }
 0x172   : > { %1698 = vst [vmem:[%s3784_s3 + $0x2d8] sm:$0xff] %v1674_v56  ;;  %1697 = vst [vmem:[%s3784_s3 + $0x2a8] sm:$0xff] %v1673_v57  ;;  %2171 = vrot.lane.b32.xlu1 %v2781_v52, %s2997_s30  ;;  %2169 = vrot.lane.b32.xlu0 %v2780_v53, %s2997_s30 }
 0x173   : > { %v2797_v52 = vld [vmem:[%s3659_s29 + $0x748] sm:$0xff]  ;;  %v2796_v53 = vld [vmem:[%s3659_s29 + $0x740] sm:$0xff] }
 0x174   : > { %v1622_v62 = vpop.permute.xlu1 %1621  ;;  %v1620_v63 = vpop.permute.xlu0 %1619 }
 0x175   : > { %v1676_v0 = vsel %vm1464_vm0, %v2629_v58, %v1622_v62  ;;  %v1675_v1 = vsel %vm1464_vm0, %v2628_v59, %v1620_v63  ;;  %v2669_v58 = vld [vmem:[%s3659_s29 + $0x348] sm:$0xff]  ;;  %v2668_v59 = vld [vmem:[%s3659_s29 + $0x340] sm:$0xff] }
 0x176   : > { %1700 = vst [vmem:[%s3784_s3 + $0x338] sm:$0xff] %v1676_v0  ;;  %1699 = vst [vmem:[%s3784_s3 + $0x308] sm:$0xff] %v1675_v1  ;;  %2175 = vrot.lane.b32.xlu1 %v2783_v60, %s2997_s30  ;;  %2173 = vrot.lane.b32.xlu0 %v2782_v61, %s2997_s30 }
 0x177   : > { %v2799_v60 = vld [vmem:[%s3659_s29 + $0x758] sm:$0xff]  ;;  %v2798_v61 = vld [vmem:[%s3659_s29 + $0x750] sm:$0xff] }
 0x178   : > { %v1626_v6 = vpop.permute.xlu1 %1625  ;;  %v1624_v7 = vpop.permute.xlu0 %1623 }
 0x179   : > { %v1678_v8 = vsel %vm1464_vm0, %v2631_v2, %v1626_v6  ;;  %v1677_v9 = vsel %vm1464_vm0, %v2630_v3, %v1624_v7  ;;  %v2671_v2 = vld [vmem:[%s3659_s29 + $0x358] sm:$0xff]  ;;  %v2670_v3 = vld [vmem:[%s3659_s29 + $0x350] sm:$0xff] }
 0x17a   : > { %1702 = vst [vmem:[%s3784_s3 + $0x398] sm:$0xff] %v1678_v8  ;;  %1701 = vst [vmem:[%s3784_s3 + $0x368] sm:$0xff] %v1677_v9  ;;  %2179 = vrot.lane.b32.xlu1 %v2785_v4, %s2997_s30  ;;  %2177 = vrot.lane.b32.xlu0 %v2784_v5, %s2997_s30 }
 0x17b   : > { %v2801_v4 = vld [vmem:[%s3659_s29 + $0x768] sm:$0xff]  ;;  %v2800_v5 = vld [vmem:[%s3659_s29 + $0x760] sm:$0xff] }
 0x17c   : > { %v1630_v14 = vpop.permute.xlu1 %1629  ;;  %v1628_v15 = vpop.permute.xlu0 %1627 }
 0x17d   : > { %v1680_v16 = vsel %vm1464_vm0, %v2633_v10, %v1630_v14  ;;  %v1679_v17 = vsel %vm1464_vm0, %v2632_v11, %v1628_v15  ;;  %v2673_v10 = vld [vmem:[%s3659_s29 + $0x368] sm:$0xff]  ;;  %v2672_v11 = vld [vmem:[%s3659_s29 + $0x360] sm:$0xff] }
 0x17e   : > { %1704 = vst [vmem:[%s3784_s3 + $0x3f8] sm:$0xff] %v1680_v16  ;;  %1703 = vst [vmem:[%s3784_s3 + $0x3c8] sm:$0xff] %v1679_v17  ;;  %2183 = vrot.lane.b32.xlu1 %v2787_v12, %s2997_s30  ;;  %2181 = vrot.lane.b32.xlu0 %v2786_v13, %s2997_s30 }
 0x17f   : > { %v2803_v12 = vld [vmem:[%s3659_s29 + $0x778] sm:$0xff]  ;;  %v2802_v13 = vld [vmem:[%s3659_s29 + $0x770] sm:$0xff] }
 0x180   : > { %v1634_v22 = vpop.permute.xlu1 %1633  ;;  %v1632_v23 = vpop.permute.xlu0 %1631 }
 0x181   : > { %v1682_v24 = vsel %vm1464_vm0, %v2635_v18, %v1634_v22  ;;  %v1681_v25 = vsel %vm1464_vm0, %v2634_v19, %v1632_v23  ;;  %v2675_v18 = vld [vmem:[%s3659_s29 + $0x378] sm:$0xff]  ;;  %v2674_v19 = vld [vmem:[%s3659_s29 + $0x370] sm:$0xff] }
 0x182   : > { %1706 = vst [vmem:[%s3784_s3 + $0x458] sm:$0xff] %v1682_v24  ;;  %1705 = vst [vmem:[%s3784_s3 + $0x428] sm:$0xff] %v1681_v25  ;;  %2187 = vrot.lane.b32.xlu1 %v2789_v20, %s2997_s30  ;;  %2185 = vrot.lane.b32.xlu0 %v2788_v21, %s2997_s30 }
 0x183   : > { %v2829_v20 = vld [vmem:[%s3659_s29 + $0x848] sm:$0xff]  ;;  %v2828_v21 = vld [vmem:[%s3659_s29 + $0x840] sm:$0xff] }
 0x184   : > { %v1784_v30 = vpop.permute.xlu1 %1783  ;;  %v1782_v31 = vpop.permute.xlu0 %1781 }
 0x185   : > { %v1854_v32 = vsel %vm1464_vm0, %v2661_v26, %v1784_v30  ;;  %v1853_v33 = vsel %vm1464_vm0, %v2660_v27, %v1782_v31  ;;  %v2677_v26 = vld [vmem:[%s3659_s29 + $0x388] sm:$0xff]  ;;  %v2676_v27 = vld [vmem:[%s3659_s29 + $0x380] sm:$0xff] }
 0x186   : > { %1878 = vst [vmem:[%s3784_s3 + $0x40] sm:$0xff] %v1854_v32  ;;  %1877 = vst [vmem:[%s3784_s3 + $0x10] sm:$0xff] %v1853_v33  ;;  %2191 = vrot.lane.b32.xlu1 %v2791_v28, %s2997_s30  ;;  %2189 = vrot.lane.b32.xlu0 %v2790_v29, %s2997_s30 }
 0x187   : > { %v2831_v28 = vld [vmem:[%s3659_s29 + $0x858] sm:$0xff]  ;;  %v2830_v29 = vld [vmem:[%s3659_s29 + $0x850] sm:$0xff] }
 0x188   : > { %v1788_v38 = vpop.permute.xlu1 %1787  ;;  %v1786_v39 = vpop.permute.xlu0 %1785 }
 0x189   : > { %v1856_v40 = vsel %vm1464_vm0, %v2663_v34, %v1788_v38  ;;  %v1855_v41 = vsel %vm1464_vm0, %v2662_v35, %v1786_v39  ;;  %v2679_v34 = vld [vmem:[%s3659_s29 + $0x398] sm:$0xff]  ;;  %v2678_v35 = vld [vmem:[%s3659_s29 + $0x390] sm:$0xff] }
 0x18a   : > { %1880 = vst [vmem:[%s3784_s3 + $0xa0] sm:$0xff] %v1856_v40  ;;  %1879 = vst [vmem:[%s3784_s3 + $0x70] sm:$0xff] %v1855_v41  ;;  %2195 = vrot.lane.b32.xlu1 %v2793_v36, %s2997_s30  ;;  %2193 = vrot.lane.b32.xlu0 %v2792_v37, %s2997_s30 }
 0x18b   : > { %v2833_v36 = vld [vmem:[%s3659_s29 + $0x868] sm:$0xff]  ;;  %v2832_v37 = vld [vmem:[%s3659_s29 + $0x860] sm:$0xff] }
 0x18c   : > { %v1792_v46 = vpop.permute.xlu1 %1791  ;;  %v1790_v47 = vpop.permute.xlu0 %1789 }
 0x18d   : > { %v1858_v48 = vsel %vm1464_vm0, %v2665_v42, %v1792_v46  ;;  %v1857_v49 = vsel %vm1464_vm0, %v2664_v43, %v1790_v47  ;;  %v2681_v42 = vld [vmem:[%s3659_s29 + $0x3a8] sm:$0xff]  ;;  %v2680_v43 = vld [vmem:[%s3659_s29 + $0x3a0] sm:$0xff] }
 0x18e   : > { %1882 = vst [vmem:[%s3784_s3 + $0x100] sm:$0xff] %v1858_v48  ;;  %1881 = vst [vmem:[%s3784_s3 + $0xd0] sm:$0xff] %v1857_v49  ;;  %2199 = vrot.lane.b32.xlu1 %v2795_v44, %s2997_s30  ;;  %2197 = vrot.lane.b32.xlu0 %v2794_v45, %s2997_s30 }
 0x18f   : > { %v2835_v44 = vld [vmem:[%s3659_s29 + $0x878] sm:$0xff]  ;;  %v2834_v45 = vld [vmem:[%s3659_s29 + $0x870] sm:$0xff] }
 0x190   : > { %v1796_v54 = vpop.permute.xlu1 %1795  ;;  %v1794_v55 = vpop.permute.xlu0 %1793 }
 0x191   : > { %v1860_v56 = vsel %vm1464_vm0, %v2667_v50, %v1796_v54  ;;  %v1859_v57 = vsel %vm1464_vm0, %v2666_v51, %v1794_v55  ;;  %v2683_v50 = vld [vmem:[%s3659_s29 + $0x3b8] sm:$0xff]  ;;  %v2682_v51 = vld [vmem:[%s3659_s29 + $0x3b0] sm:$0xff] }
 0x192   : > { %1884 = vst [vmem:[%s3784_s3 + $0x160] sm:$0xff] %v1860_v56  ;;  %1883 = vst [vmem:[%s3784_s3 + $0x130] sm:$0xff] %v1859_v57  ;;  %2203 = vrot.lane.b32.xlu1 %v2797_v52, %s2997_s30  ;;  %2201 = vrot.lane.b32.xlu0 %v2796_v53, %s2997_s30 }
 0x193   : > { %v2837_v52 = vld [vmem:[%s3659_s29 + $0x888] sm:$0xff]  ;;  %v2836_v53 = vld [vmem:[%s3659_s29 + $0x880] sm:$0xff] }
 0x194   : > { %v1800_v62 = vpop.permute.xlu1 %1799  ;;  %v1798_v63 = vpop.permute.xlu0 %1797 }
 0x195   : > { %v1862_v0 = vsel %vm1464_vm0, %v2669_v58, %v1800_v62  ;;  %v1861_v1 = vsel %vm1464_vm0, %v2668_v59, %v1798_v63  ;;  %v2709_v58 = vld [vmem:[%s3659_s29 + $0x488] sm:$0xff]  ;;  %v2708_v59 = vld [vmem:[%s3659_s29 + $0x480] sm:$0xff] }
 0x196   : > { %1886 = vst [vmem:[%s3784_s3 + $0x1c0] sm:$0xff] %v1862_v0  ;;  %1885 = vst [vmem:[%s3784_s3 + $0x190] sm:$0xff] %v1861_v1  ;;  %2207 = vrot.lane.b32.xlu1 %v2799_v60, %s2997_s30  ;;  %2205 = vrot.lane.b32.xlu0 %v2798_v61, %s2997_s30 }
 0x197   : > { %v2839_v60 = vld [vmem:[%s3659_s29 + $0x898] sm:$0xff]  ;;  %v2838_v61 = vld [vmem:[%s3659_s29 + $0x890] sm:$0xff] }
 0x198   : > { %v1804_v6 = vpop.permute.xlu1 %1803  ;;  %v1802_v7 = vpop.permute.xlu0 %1801 }
 0x199   : > { %v1864_v8 = vsel %vm1464_vm0, %v2671_v2, %v1804_v6  ;;  %v1863_v9 = vsel %vm1464_vm0, %v2670_v3, %v1802_v7  ;;  %v2711_v2 = vld [vmem:[%s3659_s29 + $0x498] sm:$0xff]  ;;  %v2710_v3 = vld [vmem:[%s3659_s29 + $0x490] sm:$0xff] }
 0x19a   : > { %1888 = vst [vmem:[%s3784_s3 + $0x220] sm:$0xff] %v1864_v8  ;;  %1887 = vst [vmem:[%s3784_s3 + $0x1f0] sm:$0xff] %v1863_v9  ;;  %2211 = vrot.lane.b32.xlu1 %v2801_v4, %s2997_s30  ;;  %2209 = vrot.lane.b32.xlu0 %v2800_v5, %s2997_s30 }
 0x19b   : > { %v2841_v4 = vld [vmem:[%s3659_s29 + $0x8a8] sm:$0xff]  ;;  %v2840_v5 = vld [vmem:[%s3659_s29 + $0x8a0] sm:$0xff] }
 0x19c   : > { %v1808_v14 = vpop.permute.xlu1 %1807  ;;  %v1806_v15 = vpop.permute.xlu0 %1805 }
 0x19d   : > { %v1866_v16 = vsel %vm1464_vm0, %v2673_v10, %v1808_v14  ;;  %v1865_v17 = vsel %vm1464_vm0, %v2672_v11, %v1806_v15  ;;  %v2713_v10 = vld [vmem:[%s3659_s29 + $0x4a8] sm:$0xff]  ;;  %v2712_v11 = vld [vmem:[%s3659_s29 + $0x4a0] sm:$0xff] }
 0x19e   : > { %1890 = vst [vmem:[%s3784_s3 + $0x280] sm:$0xff] %v1866_v16  ;;  %1889 = vst [vmem:[%s3784_s3 + $0x250] sm:$0xff] %v1865_v17  ;;  %2215 = vrot.lane.b32.xlu1 %v2803_v12, %s2997_s30  ;;  %2213 = vrot.lane.b32.xlu0 %v2802_v13, %s2997_s30 }
 0x19f   : > { %v2843_v12 = vld [vmem:[%s3659_s29 + $0x8b8] sm:$0xff]  ;;  %v2842_v13 = vld [vmem:[%s3659_s29 + $0x8b0] sm:$0xff] }
 0x1a0   : > { %v1812_v22 = vpop.permute.xlu1 %1811  ;;  %v1810_v23 = vpop.permute.xlu0 %1809 }
 0x1a1   : > { %v1868_v24 = vsel %vm1464_vm0, %v2675_v18, %v1812_v22  ;;  %v1867_v25 = vsel %vm1464_vm0, %v2674_v19, %v1810_v23  ;;  %v2715_v18 = vld [vmem:[%s3659_s29 + $0x4b8] sm:$0xff]  ;;  %v2714_v19 = vld [vmem:[%s3659_s29 + $0x4b0] sm:$0xff] }
 0x1a2   : > { %1892 = vst [vmem:[%s3784_s3 + $0x2e0] sm:$0xff] %v1868_v24  ;;  %1891 = vst [vmem:[%s3784_s3 + $0x2b0] sm:$0xff] %v1867_v25  ;;  %2365 = vrot.lane.b32.xlu1 %v2829_v20, %s2997_s30  ;;  %2363 = vrot.lane.b32.xlu0 %v2828_v21, %s2997_s30 }
 0x1a3   : > { %v2845_v20 = vld [vmem:[%s3659_s29 + $0x8c8] sm:$0xff]  ;;  %v2844_v21 = vld [vmem:[%s3659_s29 + $0x8c0] sm:$0xff] }
 0x1a4   : > { %v1816_v30 = vpop.permute.xlu1 %1815  ;;  %v1814_v31 = vpop.permute.xlu0 %1813 }
 0x1a5   : > { %v1870_v32 = vsel %vm1464_vm0, %v2677_v26, %v1816_v30  ;;  %v1869_v33 = vsel %vm1464_vm0, %v2676_v27, %v1814_v31  ;;  %v2717_v26 = vld [vmem:[%s3659_s29 + $0x4c8] sm:$0xff]  ;;  %v2716_v27 = vld [vmem:[%s3659_s29 + $0x4c0] sm:$0xff] }
 0x1a6   : > { %1894 = vst [vmem:[%s3784_s3 + $0x340] sm:$0xff] %v1870_v32  ;;  %1893 = vst [vmem:[%s3784_s3 + $0x310] sm:$0xff] %v1869_v33  ;;  %2369 = vrot.lane.b32.xlu1 %v2831_v28, %s2997_s30  ;;  %2367 = vrot.lane.b32.xlu0 %v2830_v29, %s2997_s30 }
 0x1a7   : > { %v2847_v28 = vld [vmem:[%s3659_s29 + $0x8d8] sm:$0xff]  ;;  %v2846_v29 = vld [vmem:[%s3659_s29 + $0x8d0] sm:$0xff] }
 0x1a8   : > { %v1820_v38 = vpop.permute.xlu1 %1819  ;;  %v1818_v39 = vpop.permute.xlu0 %1817 }
 0x1a9   : > { %v1872_v40 = vsel %vm1464_vm0, %v2679_v34, %v1820_v38  ;;  %v1871_v41 = vsel %vm1464_vm0, %v2678_v35, %v1818_v39  ;;  %v2719_v34 = vld [vmem:[%s3659_s29 + $0x4d8] sm:$0xff]  ;;  %v2718_v35 = vld [vmem:[%s3659_s29 + $0x4d0] sm:$0xff] }
 0x1aa   : > { %1896 = vst [vmem:[%s3784_s3 + $0x3a0] sm:$0xff] %v1872_v40  ;;  %1895 = vst [vmem:[%s3784_s3 + $0x370] sm:$0xff] %v1871_v41  ;;  %2373 = vrot.lane.b32.xlu1 %v2833_v36, %s2997_s30  ;;  %2371 = vrot.lane.b32.xlu0 %v2832_v37, %s2997_s30 }
 0x1ab   : > { %v2849_v36 = vld [vmem:[%s3659_s29 + $0x8e8] sm:$0xff]  ;;  %v2848_v37 = vld [vmem:[%s3659_s29 + $0x8e0] sm:$0xff] }
 0x1ac   : > { %v1824_v46 = vpop.permute.xlu1 %1823  ;;  %v1822_v47 = vpop.permute.xlu0 %1821 }
 0x1ad   : > { %v1874_v48 = vsel %vm1464_vm0, %v2681_v42, %v1824_v46  ;;  %v1873_v49 = vsel %vm1464_vm0, %v2680_v43, %v1822_v47  ;;  %v2721_v42 = vld [vmem:[%s3659_s29 + $0x4e8] sm:$0xff]  ;;  %v2720_v43 = vld [vmem:[%s3659_s29 + $0x4e0] sm:$0xff] }
 0x1ae   : > { %1898 = vst [vmem:[%s3784_s3 + $0x400] sm:$0xff] %v1874_v48  ;;  %1897 = vst [vmem:[%s3784_s3 + $0x3d0] sm:$0xff] %v1873_v49  ;;  %2377 = vrot.lane.b32.xlu1 %v2835_v44, %s2997_s30  ;;  %2375 = vrot.lane.b32.xlu0 %v2834_v45, %s2997_s30 }
 0x1af   : > { %v2851_v44 = vld [vmem:[%s3659_s29 + $0x8f8] sm:$0xff]  ;;  %v2850_v45 = vld [vmem:[%s3659_s29 + $0x8f0] sm:$0xff] }
 0x1b0   : > { %v1828_v54 = vpop.permute.xlu1 %1827  ;;  %v1826_v55 = vpop.permute.xlu0 %1825 }
 0x1b1   : > { %v1876_v56 = vsel %vm1464_vm0, %v2683_v50, %v1828_v54  ;;  %v1875_v57 = vsel %vm1464_vm0, %v2682_v51, %v1826_v55  ;;  %v2723_v50 = vld [vmem:[%s3659_s29 + $0x4f8] sm:$0xff]  ;;  %v2722_v51 = vld [vmem:[%s3659_s29 + $0x4f0] sm:$0xff] }
 0x1b2   : > { %1900 = vst [vmem:[%s3784_s3 + $0x460] sm:$0xff] %v1876_v56  ;;  %1899 = vst [vmem:[%s3784_s3 + $0x430] sm:$0xff] %v1875_v57  ;;  %2381 = vrot.lane.b32.xlu1 %v2837_v52, %s2997_s30  ;;  %2379 = vrot.lane.b32.xlu0 %v2836_v53, %s2997_s30 }
 0x1b3   : > { %v2725_v56 = vld [vmem:[%s3659_s29 + $0x508] sm:$0xff]  ;;  %v2724_v57 = vld [vmem:[%s3659_s29 + $0x500] sm:$0xff] }
 0x1b4   : > { %v1978_v62 = vpop.permute.xlu1 %1977  ;;  %v1976_v63 = vpop.permute.xlu0 %1975 }
 0x1b5   : > { %v2048_v0 = vsel %vm1464_vm0, %v2709_v58, %v1978_v62  ;;  %v2047_v1 = vsel %vm1464_vm0, %v2708_v59, %v1976_v63  ;;  %v2727_v62 = vld [vmem:[%s3659_s29 + $0x518] sm:$0xff]  ;;  %v2726_v63 = vld [vmem:[%s3659_s29 + $0x510] sm:$0xff] }
 0x1b6   : > { %2072 = vst [vmem:[%s3784_s3 + $0x48] sm:$0xff] %v2048_v0  ;;  %2071 = vst [vmem:[%s3784_s3 + $0x18] sm:$0xff] %v2047_v1  ;;  %2385 = vrot.lane.b32.xlu1 %v2839_v60, %s2997_s30  ;;  %2383 = vrot.lane.b32.xlu0 %v2838_v61, %s2997_s30 }
 0x1b8   : > { %v1982_v6 = vpop.permute.xlu1 %1981  ;;  %v1980_v7 = vpop.permute.xlu0 %1979 }
 0x1b9   : > { %v2050_v8 = vsel %vm1464_vm0, %v2711_v2, %v1982_v6  ;;  %v2049_v9 = vsel %vm1464_vm0, %v2710_v3, %v1980_v7 }
 0x1ba   : > { %2074 = vst [vmem:[%s3784_s3 + $0xa8] sm:$0xff] %v2050_v8  ;;  %2073 = vst [vmem:[%s3784_s3 + $0x78] sm:$0xff] %v2049_v9  ;;  %2389 = vrot.lane.b32.xlu1 %v2841_v4, %s2997_s30  ;;  %2387 = vrot.lane.b32.xlu0 %v2840_v5, %s2997_s30 }
 0x1bb   : > { %v2729_v4 = vld [vmem:[%s3659_s29 + $0x528] sm:$0xff]  ;;  %v2728_v5 = vld [vmem:[%s3659_s29 + $0x520] sm:$0xff] }
 0x1bc   : > { %v1986_v14 = vpop.permute.xlu1 %1985  ;;  %v1984_v15 = vpop.permute.xlu0 %1983 }
 0x1bd   : > { %v2052_v16 = vsel %vm1464_vm0, %v2713_v10, %v1986_v14  ;;  %v2051_v17 = vsel %vm1464_vm0, %v2712_v11, %v1984_v15  ;;  %v2731_v10 = vld [vmem:[%s3659_s29 + $0x538] sm:$0xff]  ;;  %v2730_v11 = vld [vmem:[%s3659_s29 + $0x530] sm:$0xff] }
 0x1be   : > { %2076 = vst [vmem:[%s3784_s3 + $0x108] sm:$0xff] %v2052_v16  ;;  %2075 = vst [vmem:[%s3784_s3 + $0xd8] sm:$0xff] %v2051_v17  ;;  %2393 = vrot.lane.b32.xlu1 %v2843_v12, %s2997_s30  ;;  %2391 = vrot.lane.b32.xlu0 %v2842_v13, %s2997_s30 }
 0x1bf   : > { %v2757_v16 = vld [vmem:[%s3659_s29 + $0x608] sm:$0xff]  ;;  %v2756_v17 = vld [vmem:[%s3659_s29 + $0x600] sm:$0xff] }
 0x1c0   : > { %v1990_v22 = vpop.permute.xlu1 %1989  ;;  %v1988_v23 = vpop.permute.xlu0 %1987 }
 0x1c1   : > { %v2054_v24 = vsel %vm1464_vm0, %v2715_v18, %v1990_v22  ;;  %v2053_v25 = vsel %vm1464_vm0, %v2714_v19, %v1988_v23  ;;  %v2759_v22 = vld [vmem:[%s3659_s29 + $0x618] sm:$0xff]  ;;  %v2758_v23 = vld [vmem:[%s3659_s29 + $0x610] sm:$0xff] }
 0x1c2   : > { %2078 = vst [vmem:[%s3784_s3 + $0x168] sm:$0xff] %v2054_v24  ;;  %2077 = vst [vmem:[%s3784_s3 + $0x138] sm:$0xff] %v2053_v25  ;;  %2397 = vrot.lane.b32.xlu1 %v2845_v20, %s2997_s30  ;;  %2395 = vrot.lane.b32.xlu0 %v2844_v21, %s2997_s30 }
 0x1c4   : > { %v1994_v30 = vpop.permute.xlu1 %1993  ;;  %v1992_v31 = vpop.permute.xlu0 %1991 }
 0x1c5   : > { %v2056_v32 = vsel %vm1464_vm0, %v2717_v26, %v1994_v30  ;;  %v2055_v33 = vsel %vm1464_vm0, %v2716_v27, %v1992_v31 }
 0x1c6   : > { %2080 = vst [vmem:[%s3784_s3 + $0x1c8] sm:$0xff] %v2056_v32  ;;  %2079 = vst [vmem:[%s3784_s3 + $0x198] sm:$0xff] %v2055_v33  ;;  %2401 = vrot.lane.b32.xlu1 %v2847_v28, %s2997_s30  ;;  %2399 = vrot.lane.b32.xlu0 %v2846_v29, %s2997_s30 }
 0x1c7   : > { %v2761_v28 = vld [vmem:[%s3659_s29 + $0x628] sm:$0xff]  ;;  %v2760_v29 = vld [vmem:[%s3659_s29 + $0x620] sm:$0xff] }
 0x1c8   : > { %v1998_v38 = vpop.permute.xlu1 %1997  ;;  %v1996_v39 = vpop.permute.xlu0 %1995 }
 0x1c9   : > { %v2058_v40 = vsel %vm1464_vm0, %v2719_v34, %v1998_v38  ;;  %v2057_v41 = vsel %vm1464_vm0, %v2718_v35, %v1996_v39  ;;  %v2763_v34 = vld [vmem:[%s3659_s29 + $0x638] sm:$0xff]  ;;  %v2762_v35 = vld [vmem:[%s3659_s29 + $0x630] sm:$0xff] }
 0x1ca   : > { %2082 = vst [vmem:[%s3784_s3 + $0x228] sm:$0xff] %v2058_v40  ;;  %2081 = vst [vmem:[%s3784_s3 + $0x1f8] sm:$0xff] %v2057_v41  ;;  %2405 = vrot.lane.b32.xlu1 %v2849_v36, %s2997_s30  ;;  %2403 = vrot.lane.b32.xlu0 %v2848_v37, %s2997_s30 }
 0x1cb   : > { %v2765_v40 = vld [vmem:[%s3659_s29 + $0x648] sm:$0xff]  ;;  %v2764_v41 = vld [vmem:[%s3659_s29 + $0x640] sm:$0xff] }
 0x1cc   : > { %v2002_v46 = vpop.permute.xlu1 %2001  ;;  %v2000_v47 = vpop.permute.xlu0 %1999 }
 0x1cd   : > { %v2060_v48 = vsel %vm1464_vm0, %v2721_v42, %v2002_v46  ;;  %v2059_v49 = vsel %vm1464_vm0, %v2720_v43, %v2000_v47  ;;  %v2767_v46 = vld [vmem:[%s3659_s29 + $0x658] sm:$0xff]  ;;  %v2766_v47 = vld [vmem:[%s3659_s29 + $0x650] sm:$0xff] }
 0x1ce   : > { %2084 = vst [vmem:[%s3784_s3 + $0x288] sm:$0xff] %v2060_v48  ;;  %2083 = vst [vmem:[%s3784_s3 + $0x258] sm:$0xff] %v2059_v49  ;;  %2409 = vrot.lane.b32.xlu1 %v2851_v44, %s2997_s30  ;;  %2407 = vrot.lane.b32.xlu0 %v2850_v45, %s2997_s30 }
 0x1d0   : > { %v2006_v52 = vpop.permute.xlu1 %2005  ;;  %v2004_v53 = vpop.permute.xlu0 %2003 }
 0x1d1   : > { %v2062_v54 = vsel %vm1464_vm0, %v2723_v50, %v2006_v52  ;;  %v2061_v55 = vsel %vm1464_vm0, %v2722_v51, %v2004_v53  ;;  %v2769_v52 = vld [vmem:[%s3659_s29 + $0x668] sm:$0xff]  ;;  %v2768_v53 = vld [vmem:[%s3659_s29 + $0x660] sm:$0xff] }
 0x1d2   : > { %2086 = vst [vmem:[%s3784_s3 + $0x2e8] sm:$0xff] %v2062_v54  ;;  %2085 = vst [vmem:[%s3784_s3 + $0x2b8] sm:$0xff] %v2061_v55 }
 0x1d4   : > { %v2010_v58 = vpop.permute.xlu1 %2009  ;;  %v2008_v59 = vpop.permute.xlu0 %2007 }
 0x1d5   : > { %v2064_v60 = vsel %vm1464_vm0, %v2725_v56, %v2010_v58  ;;  %v2063_v61 = vsel %vm1464_vm0, %v2724_v57, %v2008_v59  ;;  %v2771_v58 = vld [vmem:[%s3659_s29 + $0x678] sm:$0xff]  ;;  %v2770_v59 = vld [vmem:[%s3659_s29 + $0x670] sm:$0xff] }
 0x1d6   : > { %2088 = vst [vmem:[%s3784_s3 + $0x348] sm:$0xff] %v2064_v60  ;;  %2087 = vst [vmem:[%s3784_s3 + $0x318] sm:$0xff] %v2063_v61 }
 0x1d8   : > { %v2014_v0 = vpop.permute.xlu1 %2013  ;;  %v2012_v1 = vpop.permute.xlu0 %2011 }
 0x1d9   : > { %v2066_v2 = vsel %vm1464_vm0, %v2727_v62, %v2014_v0  ;;  %v2065_v3 = vsel %vm1464_vm0, %v2726_v63, %v2012_v1  ;;  %v2773_v0 = vld [vmem:[%s3659_s29 + $0x688] sm:$0xff]  ;;  %v2772_v1 = vld [vmem:[%s3659_s29 + $0x680] sm:$0xff] }
 0x1da   : > { %2090 = vst [vmem:[%s3784_s3 + $0x3a8] sm:$0xff] %v2066_v2  ;;  %2089 = vst [vmem:[%s3784_s3 + $0x378] sm:$0xff] %v2065_v3 }
 0x1dc   : > { %v2018_v6 = vpop.permute.xlu1 %2017  ;;  %v2016_v7 = vpop.permute.xlu0 %2015 }
 0x1dd   : > { %v2068_v8 = vsel %vm1464_vm0, %v2729_v4, %v2018_v6  ;;  %v2067_v9 = vsel %vm1464_vm0, %v2728_v5, %v2016_v7  ;;  %v2775_v6 = vld [vmem:[%s3659_s29 + $0x698] sm:$0xff]  ;;  %v2774_v7 = vld [vmem:[%s3659_s29 + $0x690] sm:$0xff] }
 0x1de   : > { %2092 = vst [vmem:[%s3784_s3 + $0x408] sm:$0xff] %v2068_v8  ;;  %2091 = vst [vmem:[%s3784_s3 + $0x3d8] sm:$0xff] %v2067_v9 }
 0x1e0   : > { %v2022_v12 = vpop.permute.xlu1 %2021  ;;  %v2020_v13 = vpop.permute.xlu0 %2019 }
 0x1e1   : > { %v2070_v14 = vsel %vm1464_vm0, %v2731_v10, %v2022_v12  ;;  %v2069_v15 = vsel %vm1464_vm0, %v2730_v11, %v2020_v13  ;;  %v2777_v12 = vld [vmem:[%s3659_s29 + $0x6a8] sm:$0xff]  ;;  %v2776_v13 = vld [vmem:[%s3659_s29 + $0x6a0] sm:$0xff] }
 0x1e2   : > { %2094 = vst [vmem:[%s3784_s3 + $0x468] sm:$0xff] %v2070_v14  ;;  %2093 = vst [vmem:[%s3784_s3 + $0x438] sm:$0xff] %v2069_v15 }
 0x1e4   : > { %v2172_v18 = vpop.permute.xlu1 %2171  ;;  %v2170_v19 = vpop.permute.xlu0 %2169 }
 0x1e5   : > { %v2242_v20 = vsel %vm1464_vm0, %v2757_v16, %v2172_v18  ;;  %v2241_v21 = vsel %vm1464_vm0, %v2756_v17, %v2170_v19  ;;  %v2779_v18 = vld [vmem:[%s3659_s29 + $0x6b8] sm:$0xff]  ;;  %v2778_v19 = vld [vmem:[%s3659_s29 + $0x6b0] sm:$0xff] }
 0x1e6   : > { %2266 = vst [vmem:[%s3784_s3 + $0x50] sm:$0xff] %v2242_v20  ;;  %2265 = vst [vmem:[%s3784_s3 + $0x20] sm:$0xff] %v2241_v21 }
 0x1e8   : > { %v2176_v24 = vpop.permute.xlu1 %2175  ;;  %v2174_v25 = vpop.permute.xlu0 %2173 }
 0x1e9   : > { %v2244_v26 = vsel %vm1464_vm0, %v2759_v22, %v2176_v24  ;;  %v2243_v27 = vsel %vm1464_vm0, %v2758_v23, %v2174_v25  ;;  %v2805_v24 = vld [vmem:[%s3659_s29 + $0x788] sm:$0xff]  ;;  %v2804_v25 = vld [vmem:[%s3659_s29 + $0x780] sm:$0xff] }
 0x1ea   : > { %2268 = vst [vmem:[%s3784_s3 + $0xb0] sm:$0xff] %v2244_v26  ;;  %2267 = vst [vmem:[%s3784_s3 + $0x80] sm:$0xff] %v2243_v27 }
 0x1ec   : > { %v2180_v30 = vpop.permute.xlu1 %2179  ;;  %v2178_v31 = vpop.permute.xlu0 %2177 }
 0x1ed   : > { %v2246_v32 = vsel %vm1464_vm0, %v2761_v28, %v2180_v30  ;;  %v2245_v33 = vsel %vm1464_vm0, %v2760_v29, %v2178_v31  ;;  %v2807_v30 = vld [vmem:[%s3659_s29 + $0x798] sm:$0xff]  ;;  %v2806_v31 = vld [vmem:[%s3659_s29 + $0x790] sm:$0xff] }
 0x1ee   : > { %2270 = vst [vmem:[%s3784_s3 + $0x110] sm:$0xff] %v2246_v32  ;;  %2269 = vst [vmem:[%s3784_s3 + $0xe0] sm:$0xff] %v2245_v33 }
 0x1f0   : > { %v2184_v36 = vpop.permute.xlu1 %2183  ;;  %v2182_v37 = vpop.permute.xlu0 %2181 }
 0x1f1   : > { %v2248_v38 = vsel %vm1464_vm0, %v2763_v34, %v2184_v36  ;;  %v2247_v39 = vsel %vm1464_vm0, %v2762_v35, %v2182_v37  ;;  %v2809_v36 = vld [vmem:[%s3659_s29 + $0x7a8] sm:$0xff]  ;;  %v2808_v37 = vld [vmem:[%s3659_s29 + $0x7a0] sm:$0xff] }
 0x1f2   : > { %2272 = vst [vmem:[%s3784_s3 + $0x170] sm:$0xff] %v2248_v38  ;;  %2271 = vst [vmem:[%s3784_s3 + $0x140] sm:$0xff] %v2247_v39 }
 0x1f4   : > { %v2188_v42 = vpop.permute.xlu1 %2187  ;;  %v2186_v43 = vpop.permute.xlu0 %2185 }
 0x1f5   : > { %v2250_v44 = vsel %vm1464_vm0, %v2765_v40, %v2188_v42  ;;  %v2249_v45 = vsel %vm1464_vm0, %v2764_v41, %v2186_v43  ;;  %v2811_v42 = vld [vmem:[%s3659_s29 + $0x7b8] sm:$0xff]  ;;  %v2810_v43 = vld [vmem:[%s3659_s29 + $0x7b0] sm:$0xff] }
 0x1f6   : > { %2274 = vst [vmem:[%s3784_s3 + $0x1d0] sm:$0xff] %v2250_v44  ;;  %2273 = vst [vmem:[%s3784_s3 + $0x1a0] sm:$0xff] %v2249_v45 }
 0x1f8   : > { %v2192_v48 = vpop.permute.xlu1 %2191  ;;  %v2190_v49 = vpop.permute.xlu0 %2189 }
 0x1f9   : > { %v2252_v50 = vsel %vm1464_vm0, %v2767_v46, %v2192_v48  ;;  %v2251_v51 = vsel %vm1464_vm0, %v2766_v47, %v2190_v49  ;;  %v2813_v48 = vld [vmem:[%s3659_s29 + $0x7c8] sm:$0xff]  ;;  %v2812_v49 = vld [vmem:[%s3659_s29 + $0x7c0] sm:$0xff] }
 0x1fa   : > { %2276 = vst [vmem:[%s3784_s3 + $0x230] sm:$0xff] %v2252_v50  ;;  %2275 = vst [vmem:[%s3784_s3 + $0x200] sm:$0xff] %v2251_v51 }
 0x1fc   : > { %v2196_v54 = vpop.permute.xlu1 %2195  ;;  %v2194_v55 = vpop.permute.xlu0 %2193 }
 0x1fd   : > { %v2254_v56 = vsel %vm1464_vm0, %v2769_v52, %v2196_v54  ;;  %v2253_v57 = vsel %vm1464_vm0, %v2768_v53, %v2194_v55  ;;  %v2815_v54 = vld [vmem:[%s3659_s29 + $0x7d8] sm:$0xff]  ;;  %v2814_v55 = vld [vmem:[%s3659_s29 + $0x7d0] sm:$0xff] }
 0x1fe   : > { %2278 = vst [vmem:[%s3784_s3 + $0x290] sm:$0xff] %v2254_v56  ;;  %2277 = vst [vmem:[%s3784_s3 + $0x260] sm:$0xff] %v2253_v57 }
 0x200   : > { %v2200_v60 = vpop.permute.xlu1 %2199  ;;  %v2198_v61 = vpop.permute.xlu0 %2197 }
 0x201   : > { %v2256_v62 = vsel %vm1464_vm0, %v2771_v58, %v2200_v60  ;;  %v2255_v63 = vsel %vm1464_vm0, %v2770_v59, %v2198_v61  ;;  %v2817_v60 = vld [vmem:[%s3659_s29 + $0x7e8] sm:$0xff]  ;;  %v2816_v61 = vld [vmem:[%s3659_s29 + $0x7e0] sm:$0xff] }
 0x202   : > { %2280 = vst [vmem:[%s3784_s3 + $0x2f0] sm:$0xff] %v2256_v62  ;;  %2279 = vst [vmem:[%s3784_s3 + $0x2c0] sm:$0xff] %v2255_v63 }
 0x204   : > { %v2204_v2 = vpop.permute.xlu1 %2203  ;;  %v2202_v3 = vpop.permute.xlu0 %2201 }
 0x205   : > { %v2258_v4 = vsel %vm1464_vm0, %v2773_v0, %v2204_v2  ;;  %v2257_v5 = vsel %vm1464_vm0, %v2772_v1, %v2202_v3  ;;  %v2819_v2 = vld [vmem:[%s3659_s29 + $0x7f8] sm:$0xff]  ;;  %v2818_v3 = vld [vmem:[%s3659_s29 + $0x7f0] sm:$0xff] }
 0x206   : > { %2282 = vst [vmem:[%s3784_s3 + $0x350] sm:$0xff] %v2258_v4  ;;  %2281 = vst [vmem:[%s3784_s3 + $0x320] sm:$0xff] %v2257_v5 }
 0x208   : > { %v2208_v8 = vpop.permute.xlu1 %2207  ;;  %v2206_v9 = vpop.permute.xlu0 %2205 }
 0x209   : > { %v2260_v10 = vsel %vm1464_vm0, %v2775_v6, %v2208_v8  ;;  %v2259_v11 = vsel %vm1464_vm0, %v2774_v7, %v2206_v9  ;;  %v2821_v8 = vld [vmem:[%s3659_s29 + $0x808] sm:$0xff]  ;;  %v2820_v9 = vld [vmem:[%s3659_s29 + $0x800] sm:$0xff] }
 0x20a   : > { %2284 = vst [vmem:[%s3784_s3 + $0x3b0] sm:$0xff] %v2260_v10  ;;  %2283 = vst [vmem:[%s3784_s3 + $0x380] sm:$0xff] %v2259_v11 }
 0x20c   : > { %v2212_v14 = vpop.permute.xlu1 %2211  ;;  %v2210_v15 = vpop.permute.xlu0 %2209 }
 0x20d   : > { %v2262_v16 = vsel %vm1464_vm0, %v2777_v12, %v2212_v14  ;;  %v2261_v17 = vsel %vm1464_vm0, %v2776_v13, %v2210_v15  ;;  %v2823_v14 = vld [vmem:[%s3659_s29 + $0x818] sm:$0xff]  ;;  %v2822_v15 = vld [vmem:[%s3659_s29 + $0x810] sm:$0xff] }
 0x20e   : > { %2286 = vst [vmem:[%s3784_s3 + $0x410] sm:$0xff] %v2262_v16  ;;  %2285 = vst [vmem:[%s3784_s3 + $0x3e0] sm:$0xff] %v2261_v17 }
 0x210   : > { %v2216_v20 = vpop.permute.xlu1 %2215  ;;  %v2214_v21 = vpop.permute.xlu0 %2213 }
 0x211   : > { %v2264_v22 = vsel %vm1464_vm0, %v2779_v18, %v2216_v20  ;;  %v2263_v23 = vsel %vm1464_vm0, %v2778_v19, %v2214_v21  ;;  %v2825_v20 = vld [vmem:[%s3659_s29 + $0x828] sm:$0xff]  ;;  %v2824_v21 = vld [vmem:[%s3659_s29 + $0x820] sm:$0xff] }
 0x212   : > { %2288 = vst [vmem:[%s3784_s3 + $0x470] sm:$0xff] %v2264_v22  ;;  %2287 = vst [vmem:[%s3784_s3 + $0x440] sm:$0xff] %v2263_v23 }
 0x214   : > { %v2366_v26 = vpop.permute.xlu1 %2365  ;;  %v2364_v27 = vpop.permute.xlu0 %2363 }
 0x215   : > { %v2436_v28 = vsel %vm1464_vm0, %v2805_v24, %v2366_v26  ;;  %v2435_v29 = vsel %vm1464_vm0, %v2804_v25, %v2364_v27  ;;  %v2827_v26 = vld [vmem:[%s3659_s29 + $0x838] sm:$0xff]  ;;  %v2826_v27 = vld [vmem:[%s3659_s29 + $0x830] sm:$0xff] }
 0x216   : > { %2460 = vst [vmem:[%s3784_s3 + $0x58] sm:$0xff] %v2436_v28  ;;  %2459 = vst [vmem:[%s3784_s3 + $0x28] sm:$0xff] %v2435_v29 }
 0x218   : > { %v2370_v32 = vpop.permute.xlu1 %2369  ;;  %v2368_v33 = vpop.permute.xlu0 %2367 }
 0x219   : > { %v2438_v34 = vsel %vm1464_vm0, %v2807_v30, %v2370_v32  ;;  %v2437_v35 = vsel %vm1464_vm0, %v2806_v31, %v2368_v33 }
 0x21a   : > { %2462 = vst [vmem:[%s3784_s3 + $0xb8] sm:$0xff] %v2438_v34  ;;  %2461 = vst [vmem:[%s3784_s3 + $0x88] sm:$0xff] %v2437_v35 }
 0x21c   : > { %v2374_v38 = vpop.permute.xlu1 %2373  ;;  %v2372_v39 = vpop.permute.xlu0 %2371 }
 0x21d   : > { %v2440_v40 = vsel %vm1464_vm0, %v2809_v36, %v2374_v38  ;;  %v2439_v41 = vsel %vm1464_vm0, %v2808_v37, %v2372_v39 }
 0x21e   : > { %2464 = vst [vmem:[%s3784_s3 + $0x118] sm:$0xff] %v2440_v40  ;;  %2463 = vst [vmem:[%s3784_s3 + $0xe8] sm:$0xff] %v2439_v41 }
 0x220   : > { %v2378_v44 = vpop.permute.xlu1 %2377  ;;  %v2376_v45 = vpop.permute.xlu0 %2375 }
 0x221   : > { %v2442_v46 = vsel %vm1464_vm0, %v2811_v42, %v2378_v44  ;;  %v2441_v47 = vsel %vm1464_vm0, %v2810_v43, %v2376_v45 }
 0x222   : > { %2466 = vst [vmem:[%s3784_s3 + $0x178] sm:$0xff] %v2442_v46  ;;  %2465 = vst [vmem:[%s3784_s3 + $0x148] sm:$0xff] %v2441_v47 }
 0x224   : > { %v2382_v50 = vpop.permute.xlu1 %2381  ;;  %v2380_v51 = vpop.permute.xlu0 %2379 }
 0x225   : > { %v2444_v52 = vsel %vm1464_vm0, %v2813_v48, %v2382_v50  ;;  %v2443_v53 = vsel %vm1464_vm0, %v2812_v49, %v2380_v51 }
 0x226   : > { %2468 = vst [vmem:[%s3784_s3 + $0x1d8] sm:$0xff] %v2444_v52  ;;  %2467 = vst [vmem:[%s3784_s3 + $0x1a8] sm:$0xff] %v2443_v53 }
 0x228   : > { %v2386_v56 = vpop.permute.xlu1 %2385  ;;  %v2384_v57 = vpop.permute.xlu0 %2383 }
 0x229   : > { %v2446_v58 = vsel %vm1464_vm0, %v2815_v54, %v2386_v56  ;;  %v2445_v59 = vsel %vm1464_vm0, %v2814_v55, %v2384_v57 }
 0x22a   : > { %2470 = vst [vmem:[%s3784_s3 + $0x238] sm:$0xff] %v2446_v58  ;;  %2469 = vst [vmem:[%s3784_s3 + $0x208] sm:$0xff] %v2445_v59 }
 0x22c   : > { %v2390_v62 = vpop.permute.xlu1 %2389  ;;  %v2388_v63 = vpop.permute.xlu0 %2387 }
 0x22d   : > { %v2448_v0 = vsel %vm1464_vm0, %v2817_v60, %v2390_v62  ;;  %v2447_v1 = vsel %vm1464_vm0, %v2816_v61, %v2388_v63 }
 0x22e   : > { %2472 = vst [vmem:[%s3784_s3 + $0x298] sm:$0xff] %v2448_v0  ;;  %2471 = vst [vmem:[%s3784_s3 + $0x268] sm:$0xff] %v2447_v1 }
 0x230   : > { %v2394_v4 = vpop.permute.xlu1 %2393  ;;  %v2392_v5 = vpop.permute.xlu0 %2391 }
 0x231   : > { %v2450_v6 = vsel %vm1464_vm0, %v2819_v2, %v2394_v4  ;;  %v2449_v7 = vsel %vm1464_vm0, %v2818_v3, %v2392_v5 }
 0x232   : > { %2474 = vst [vmem:[%s3784_s3 + $0x2f8] sm:$0xff] %v2450_v6  ;;  %2473 = vst [vmem:[%s3784_s3 + $0x2c8] sm:$0xff] %v2449_v7 }
 0x234   : > { %v2398_v10 = vpop.permute.xlu1 %2397  ;;  %v2396_v11 = vpop.permute.xlu0 %2395 }
 0x235   : > { %v2452_v12 = vsel %vm1464_vm0, %v2821_v8, %v2398_v10  ;;  %v2451_v13 = vsel %vm1464_vm0, %v2820_v9, %v2396_v11 }
 0x236   : > { %2476 = vst [vmem:[%s3784_s3 + $0x358] sm:$0xff] %v2452_v12  ;;  %2475 = vst [vmem:[%s3784_s3 + $0x328] sm:$0xff] %v2451_v13 }
 0x238   : > { %v2402_v16 = vpop.permute.xlu1 %2401  ;;  %v2400_v17 = vpop.permute.xlu0 %2399 }
 0x239   : > { %v2454_v18 = vsel %vm1464_vm0, %v2823_v14, %v2402_v16  ;;  %v2453_v19 = vsel %vm1464_vm0, %v2822_v15, %v2400_v17 }
 0x23a   : > { %2478 = vst [vmem:[%s3784_s3 + $0x3b8] sm:$0xff] %v2454_v18  ;;  %2477 = vst [vmem:[%s3784_s3 + $0x388] sm:$0xff] %v2453_v19 }
 0x23c   : > { %v2406_v22 = vpop.permute.xlu1 %2405  ;;  %v2404_v23 = vpop.permute.xlu0 %2403 }
 0x23d   : > { %v2456_v24 = vsel %vm1464_vm0, %v2825_v20, %v2406_v22  ;;  %v2455_v25 = vsel %vm1464_vm0, %v2824_v21, %v2404_v23 }
 0x23e   : > { %2480 = vst [vmem:[%s3784_s3 + $0x418] sm:$0xff] %v2456_v24  ;;  %2479 = vst [vmem:[%s3784_s3 + $0x3e8] sm:$0xff] %v2455_v25 }
 0x240   : > { %v2410_v28 = vpop.permute.xlu1 %2409  ;;  %v2408_v29 = vpop.permute.xlu0 %2407 }
 0x241   : > { %v2458_v30 = vsel %vm1464_vm0, %v2827_v26, %v2410_v28  ;;  %v2457_v31 = vsel %vm1464_vm0, %v2826_v27, %v2408_v29 }
 0x242   : > { %2482 = vst [vmem:[%s3784_s3 + $0x478] sm:$0xff] %v2458_v30  ;;  %2481 = vst [vmem:[%s3784_s3 + $0x448] sm:$0xff] %v2457_v31 }
 0x243   : > { %2932 = shalt.err (!%p2929_p7)
}
 0x244   : > { %s2933_s23 = scalar_lea.hbm %s4385_s15, 18432  ;;  %s2937_s26 = scalar_lea.hbm %s4440_s1, 36864 }
 0x245   : > { %p2934_p8 = scmp.ne.s32.totalorder %s4385_s15, %s2933_s23  ;;  %p2938_p13 = scmp.lt.s32.totalorder %s4385_s15, %s4440_s1 }
 0x246   : > { %p2939_p0 = scmp.lt.s32.totalorder %s2937_s26, %s2933_s23 }
 0x247   : > { %p2935_p11 = pnand %p2934_p8, %p3050_p5 }
 0x248   : > { %p2940_p1 = por %p2939_p0, %p2938_p13 }
 0x249   : > { %p2936_p12 = pneg %p2935_p11 }
 0x24b   : > { %p2941_p2 = pnand %p2940_p1, %p2936_p12 }
 0x24d   : > { %2944 = shalt.err (!%p2941_p2)
}
 0x24e   : > { %s2999_s30 = smov 768   ;;  %s3000_s2 = smov 48  }
 0x24f   : > { %2860 = dma.vmem_to_hbm [thread:$0]  (%p3050_p5), %s4387_s5, 18432, %s4385_s15, %s2484_s9, %s2999_s30, %s2999_s30, %s3000_s2  }
 0x250 PF: > { %s2515_s3 = sand.u32 1, %s2975_s6   ;;  %p2863_p3 = pnand %p2585_p10, %p3061_p9 }
 0x251   : > { %s2516_s4 = scalar_lea.sflag [#allocation4], %s2515_s3 }
 0x252   : > { %p2864_p4 = pneg %p2863_p3 }
 0x254   : > { %2970 = dma.done.wait (%p2864_p4), %s2516_s4, 18432  }
 0x255   : > { %2972 = vsyncadd (%p2864_p4), %s2516_s4, 4294948864  ;;  %s14_s11 = sadd.s32 1, %s2995_s11   ;;  %s4443_s6 = smov %s2979_s7 }
 0x256   : > { %p11_p6 = scmp.ge.s32.totalorder %s14_s11, 4   ;;  %s4444_s7 = smov %s2983_s8 }
 0x257   : > { %s4445_s8 = smov %s3059_s18  ;;  %s4446_s9 = smov %s2991_s10 }
 0x258   : > { %s4447_s10 = smov %s4449_s14  ;;  %13 = sbr.rel (!%p11_p6) target bundleno = 4 (0x4), region = 113 }
 0x25d   :  { %2521 = vsyncpa [#allocation4], 1 }
 0x25e   :  { %2523 = vsyncpa [#allocation4 + $0x1], 1 }

</bundles_post_ra>
